<compile_context>
chip_gen: v7x
topology: tpu7x:2x2x1
jax: 0.10.0
libtpu: 0.0.40
codegen_flags: <defaults>
</compile_context>

<pallas_src>
import jax
import jax.numpy as jnp
from jax import lax
from jax.experimental import pallas as pl
from jax.experimental.pallas import tpu as pltpu

DIM = 6
TRIU = DIM * (DIM + 1) // 2        # 21
EPS = 1e-5
SLAB_SUB, SLAB_LANE = 8, 128       # one (8,128) f32 vreg
SLAB = SLAB_SUB * SLAB_LANE        # 1024 batch elements per slab
MAX_SLABS_PER_TILE = 8             # up to 8192 batch elements per grid step

# (i, j) pairs of the upper-triangular vector, row-major (triu_indices order).
_TRIU_IJ = [(i, j) for i in range(DIM) for j in range(i, DIM)]
_TRIU_IDX = {ij: k for k, ij in enumerate(_TRIU_IJ)}


def _slab_kl_huber(t_ref, p_ref, row0, valid):
    """KL + Huber partial sums for one (8,128) slab of the batch.

    t_ref / p_ref: (21, MID, 128) VMEM refs (current input block).
    row0:          static sublane-row offset of this slab inside the block.
    valid:         (8,128) bool mask, True for real (non-padded) lanes.
    Returns (kl, hub), each (8,128) f32.  kl is masked to 0 on padded lanes;
    huber is exactly 0 there because the padding is zero.
    """
    def tload(idx):
        return t_ref[idx, row0:row0 + SLAB_SUB, :]          # (8,128)

    def pload(idx):
        return p_ref[idx, row0:row0 + SLAB_SUB, :]          # (8,128)

    # ---- Huber loss (delta = 1.0), summed over the 21 entries per lane ----
    hub = None
    for idx in range(TRIU):
        d = pload(idx) - tload(idx)
        ad = jnp.abs(d)
        h = jnp.where(ad < 1.0, 0.5 * d * d, ad - 0.5)
        hub = h if hub is None else hub + h

    # ---- column-ordered 6x6 Cholesky with lazy row loads -------------------
    # The reciprocal pivot (rsqrt) replaces every divide and is only live
    # inside its own column; 0.5*logdet is accumulated from per-pivot logs
    # (EUP slot, effectively free, reference-exact numerics).
    def chol(load):
        L = [[None] * DIM for _ in range(DIM)]
        inv_d = [None] * DIM
        half_logdet = None
        for j in range(DIM):
            s = load(_TRIU_IDX[(j, j)]) + EPS
            for k in range(j):
                s = s - L[j][k] * L[j][k]
            inv = lax.rsqrt(s)
            inv_d[j] = inv
            L[j][j] = s * inv                                # == sqrt(s)
            lg = 0.5 * jnp.log(s)                            # == log L[j][j]
            half_logdet = lg if half_logdet is None else half_logdet + lg
            for i in range(j + 1, DIM):
                si = load(_TRIU_IDX[(j, i)])                 # A[i][j], i > j
                for k in range(j):
                    si = si - L[i][k] * L[j][k]
                L[i][j] = si * inv
        return L, inv_d, half_logdet

    Lp, _, half_logdet_p = chol(pload)       # covariance of P (pred)
    Lq, invq, half_logdet_q = chol(tload)    # covariance of Q (target)

    # tr(Sq^{-1} Sp) = || Lq^{-1} Lp ||_F^2 via forward substitution per
    # column of Lp (each Lp column dies as soon as it is consumed).
    tr = None
    for j in range(DIM):
        col = [None] * DIM
        for i in range(j, DIM):
            s = Lp[i][j]
            for k in range(j, i):
                s = s - Lq[i][k] * col[k]
            y = s * invq[i]
            col[i] = y
            tr = y * y if tr is None else tr + y * y

    # KL = 0.5*(tr - k) + 0.5*(logdet Sq - logdet Sp)
    kl = 0.5 * (tr - float(DIM)) + (half_logdet_q - half_logdet_p)
    kl = jnp.where(valid, kl, 0.0)
    return kl, hub


def _make_kernel(batch, spt, spc):
    """Kernel closure.  batch/spt/spc are static Python ints."""

    def kernel(t_ref, p_ref, out_ref):
        # out_ref: (16,128) resident per-core accumulator block:
        #   rows 0..7  = per-lane KL partial sums
        #   rows 8..15 = per-lane Huber partial sums
        @pl.when(pl.program_id(1) == 0)
        def _():
            out_ref[...] = jnp.zeros_like(out_ref)

        # Hoisted iota: batch index of each (sublane, lane) within a slab.
        sub = lax.broadcasted_iota(jnp.int32, (SLAB_SUB, SLAB_LANE), 0)
        lane = lax.broadcasted_iota(jnp.int32, (SLAB_SUB, SLAB_LANE), 1)
        in_slab = sub * SLAB_LANE + lane                    # 0 .. 1023

        tile_row0 = (pl.program_id(0) * spc + pl.program_id(1)) * (SLAB_SUB * spt)

        kl_acc = jnp.zeros((SLAB_SUB, SLAB_LANE), jnp.float32)
        hub_acc = jnp.zeros((SLAB_SUB, SLAB_LANE), jnp.float32)
        # Fully unrolled slab loop (static slices, full LLO visibility).
        for c in range(spt):
            row0 = c * SLAB_SUB
            thresh = batch - (tile_row0 + row0) * SLAB_LANE  # scalar
            valid = in_slab < thresh
            kl, hub = _slab_kl_huber(t_ref, p_ref, row0, valid)
            kl_acc = kl_acc + kl
            hub_acc = hub_acc + hub

        # Two (8,128)-aligned, unmasked, lane-dense accumulator stores.
        out_ref[0:SLAB_SUB, :] += kl_acc
        out_ref[SLAB_SUB:2 * SLAB_SUB, :] += hub_acc

    return kernel


def kl_divergence_loss(target, pred):
    """target, pred: (B, 21) float32 upper-triangular covariance vectors."""
    B = target.shape[0]
    assert target.shape == (B, TRIU) and pred.shape == (B, TRIU)

    def cdiv(a, b):
        return -(-a // b)

    n_slabs = max(1, cdiv(B, SLAB))                 # (8,128) slabs of batch
    ncores = 2 if n_slabs >= 2 else 1               # leading "parallel" axis
    spc = cdiv(n_slabs, ncores * MAX_SLABS_PER_TILE)  # grid steps per core
    spt = cdiv(n_slabs, ncores * spc)               # slabs per grid step
    padded_slabs = ncores * spc * spt
    bp = padded_slabs * SLAB                        # padded batch size

    def prep(x):
        x = jnp.asarray(x, jnp.float32)
        # Zero padding; padded lanes are exactly masked out in-kernel.
        x = jnp.pad(x, ((0, bp - B), (0, 0)))
        # (bp,21) -> (21, bp//128, 128): batch packed over sublanes+lanes so
        # every kernel intermediate is a full (8,128) vreg.
        return x.T.reshape(TRIU, bp // SLAB_LANE, SLAB_LANE)

    kernel = _make_kernel(B, spt, spc)

    grid_spec = pltpu.PrefetchScalarGridSpec(
        num_scalar_prefetch=0,
        grid=(ncores, spc),
        in_specs=[
            pl.BlockSpec((TRIU, SLAB_SUB * spt, SLAB_LANE),
                         lambda c, s: (0, c * spc + s, 0)),
            pl.BlockSpec((TRIU, SLAB_SUB * spt, SLAB_LANE),
                         lambda c, s: (0, c * spc + s, 0)),
        ],
        out_specs=pl.BlockSpec((2 * SLAB_SUB, SLAB_LANE), lambda c, s: (c, 0)),
    )

    out = pl.pallas_call(
        kernel,
        out_shape=jax.ShapeDtypeStruct((ncores * 2 * SLAB_SUB, SLAB_LANE),
                                       jnp.float32),
        grid_spec=grid_spec,
        compiler_params=pltpu.CompilerParams(
            dimension_semantics=("parallel", "arbitrary")),
    )(prep(target), prep(pred))

    out = out.reshape(ncores, 2, SLAB_SUB, SLAB_LANE)
    kl_sum = jnp.sum(out[:, 0])
    hub_sum = jnp.sum(out[:, 1])
    return kl_sum / B + hub_sum / (B * TRIU)


def _reference(target, pred):
    """Pure-JAX reference for a correctness check."""
    d = pred - target
    ad = jnp.abs(d)
    hub = jnp.mean(jnp.where(ad < 1.0, 0.5 * d * d, ad - 0.5))

    rows = jnp.array([i for (i, _) in _TRIU_IJ])
    cols = jnp.array([j for (_, j) in _TRIU_IJ])

    def tomat(v):
        M = jnp.zeros((v.shape[0], DIM, DIM), jnp.float32)
        M = M.at[:, rows, cols].set(v)
        M = M.at[:, cols, rows].set(v)
        return M + jnp.eye(DIM, dtype=jnp.float32) * EPS

    Sp = tomat(pred)
    Sq = tomat(target)
    Lp = jnp.linalg.cholesky(Sp)
    Lq = jnp.linalg.cholesky(Sq)
    M = jax.scipy.linalg.solve_triangular(Lq, Lp, lower=True)
    tr = jnp.sum(M * M, axis=(-1, -2))
    ld_p = 2.0 * jnp.sum(jnp.log(jnp.diagonal(Lp, axis1=-2, axis2=-1)), -1)
    ld_q = 2.0 * jnp.sum(jnp.log(jnp.diagonal(Lq, axis1=-2, axis2=-1)), -1)
    kl = 0.5 * (tr - DIM + ld_q - ld_p)
    return jnp.mean(kl) + hub


if __name__ == "__main__":
    key = jax.random.PRNGKey(0)

    rows = jnp.array([i for (i, _) in _TRIU_IJ])
    cols = jnp.array([j for (_, j) in _TRIU_IJ])

    def make_spd_vec(k, b):
        # Well-conditioned SPD 6x6 covariance per batch element, then its
        # upper-triangular vector (the module's expected input form).
        A = jax.random.normal(k, (b, DIM, DIM), dtype=jnp.float32)
        cov = jnp.einsum("bij,bkj->bik", A, A) / DIM + 0.5 * jnp.eye(
            DIM, dtype=jnp.float32)
        return cov[:, rows, cols]                # (b, 21)

    ok = True
    # B=8: small canonical case (1-D work, heavy padding, masked exactly).
    # B=2500: exercises the 2-core grid, partial and fully-padded slabs.
    for case, b in ((0, 8), (1, 2500)):
        k1, k2 = jax.random.split(jax.random.fold_in(key, case))
        target = make_spd_vec(k1, b)
        pred = make_spd_vec(k2, b)

        out = jax.block_until_ready(kl_divergence_loss(target, pred))
        ref = jax.block_until_ready(_reference(target, pred))

        tol = 2e-3 * max(1.0, abs(float(ref)))
        if not bool(jnp.isfinite(out)) or abs(float(out) - float(ref)) > tol:
            ok = False
            print(f"mismatch at B={b}: pallas={float(out)} ref={float(ref)}")

    if not ok:
        raise AssertionError("Pallas kernel does not match reference")
    print("KERNEL_OK")
</pallas_src>

<mosaic_0001>
module attributes {stable_mosaic.version = 11 : i64} {
  func.func @kernel(%arg0: i32, %arg1: i32, %arg2: memref<21x8x128xf32, #tpu.memory_space<vmem>>, %arg3: memref<21x8x128xf32, #tpu.memory_space<vmem>>, %arg4: memref<16x128xf32, #tpu.memory_space<vmem>>) attributes {dimension_semantics = [#tpu.dimension_semantics<parallel>, #tpu.dimension_semantics<arbitrary>], iteration_bounds = array<i64: 1, 1>, scalar_prefetch = 0 : i64, scratch_operands = 0 : i64, tpu.core_type = #tpu.core_type<tc>, window_params = [{transform_indices = @transform_0, window_bounds = array<i64: 21, 8, 128>}, {transform_indices = @transform_1, window_bounds = array<i64: 21, 8, 128>}, {transform_indices = @transform_2, window_bounds = array<i64: 16, 128>}]} {
    %c0_i32 = arith.constant 0 : i32
    %0 = arith.cmpi eq, %arg1, %c0_i32 : i32
    %1 = arith.extui %0 : i1 to i32
    %c0_i32_0 = arith.constant 0 : i32
    %2 = arith.cmpi ne, %1, %c0_i32_0 : i32
    scf.if %2 {
      %cst_334 = arith.constant 0.000000e+00 : f32
      %822 = vector.broadcast %cst_334 : f32 to vector<16x128xf32>
      %c0_335 = arith.constant 0 : index
      %c0_336 = arith.constant 0 : index
      %823 = vector.load %arg4[%c0_335, %c0_336] : memref<16x128xf32, #tpu.memory_space<vmem>>, vector<16x128xf32>
      tpu.vector_store %arg4[%c0_335, %c0_336], %822 {strides = array<i32>} : memref<16x128xf32, #tpu.memory_space<vmem>>, vector<16x128xf32>,
    } else {
    }
    %3 = tpu.iota {dimensions = array<i32: 0>} : vector<8x128xi32>
    %4 = tpu.iota {dimensions = array<i32: 1>} : vector<8x128xi32>
    %c128_i32 = arith.constant 128 : i32
    %5 = vector.broadcast %c128_i32 : i32 to vector<8x128xi32>
    %6 = arith.muli %3, %5 : vector<8x128xi32>
    %7 = arith.addi %6, %4 : vector<8x128xi32>
    %c1_i32 = arith.constant 1 : i32
    %8 = arith.muli %arg0, %c1_i32 : i32
    %9 = arith.addi %8, %arg1 : i32
    %c8_i32 = arith.constant 8 : i32
    %10 = arith.muli %9, %c8_i32 : i32
    %cst = arith.constant 0.000000e+00 : f32
    %11 = vector.broadcast %cst : f32 to vector<8x128xf32>
    %cst_1 = arith.constant 0.000000e+00 : f32
    %12 = vector.broadcast %cst_1 : f32 to vector<8x128xf32>
    %c0_i32_2 = arith.constant 0 : i32
    %13 = arith.addi %10, %c0_i32_2 : i32
    %c128_i32_3 = arith.constant 128 : i32
    %14 = arith.muli %13, %c128_i32_3 : i32
    %c8_i32_4 = arith.constant 8 : i32
    %15 = arith.subi %c8_i32_4, %14 : i32
    %16 = vector.broadcast %15 : i32 to vector<8x128xi32>
    %17 = arith.cmpi slt, %7, %16 : vector<8x128xi32>
    %c0 = arith.constant 0 : index
    %c0_5 = arith.constant 0 : index
    %c0_6 = arith.constant 0 : index
    %18 = vector.load %arg3[%c0, %c0_5, %c0_6] : memref<21x8x128xf32, #tpu.memory_space<vmem>>, vector<1x8x128xf32>
    %19 = vector.shape_cast %18 : vector<1x8x128xf32> to vector<8x128xf32>
    %c0_7 = arith.constant 0 : index
    %c0_8 = arith.constant 0 : index
    %c0_9 = arith.constant 0 : index
    %20 = vector.load %arg2[%c0_7, %c0_8, %c0_9] : memref<21x8x128xf32, #tpu.memory_space<vmem>>, vector<1x8x128xf32>
    %21 = vector.shape_cast %20 : vector<1x8x128xf32> to vector<8x128xf32>
    %22 = arith.subf %19, %21 : vector<8x128xf32>
    %23 = math.absf %22 : vector<8x128xf32>
    %cst_10 = arith.constant 1.000000e+00 : f32
    %24 = vector.broadcast %cst_10 : f32 to vector<8x128xf32>
    %25 = arith.cmpf olt, %23, %24 : vector<8x128xf32>
    %cst_11 = arith.constant 5.000000e-01 : f32
    %26 = vector.broadcast %cst_11 : f32 to vector<8x128xf32>
    %27 = arith.mulf %26, %22 : vector<8x128xf32>
    %28 = arith.mulf %27, %22 : vector<8x128xf32>
    %cst_12 = arith.constant 5.000000e-01 : f32
    %29 = vector.broadcast %cst_12 : f32 to vector<8x128xf32>
    %30 = arith.subf %23, %29 : vector<8x128xf32>
    %31 = arith.select %25, %28, %30 : vector<8x128xi1>, vector<8x128xf32>
    %c1 = arith.constant 1 : index
    %c0_13 = arith.constant 0 : index
    %c0_14 = arith.constant 0 : index
    %32 = vector.load %arg3[%c1, %c0_13, %c0_14] : memref<21x8x128xf32, #tpu.memory_space<vmem>>, vector<1x8x128xf32>
    %33 = vector.shape_cast %32 : vector<1x8x128xf32> to vector<8x128xf32>
    %c1_15 = arith.constant 1 : index
    %c0_16 = arith.constant 0 : index
    %c0_17 = arith.constant 0 : index
    %34 = vector.load %arg2[%c1_15, %c0_16, %c0_17] : memref<21x8x128xf32, #tpu.memory_space<vmem>>, vector<1x8x128xf32>
    %35 = vector.shape_cast %34 : vector<1x8x128xf32> to vector<8x128xf32>
    %36 = arith.subf %33, %35 : vector<8x128xf32>
    %37 = math.absf %36 : vector<8x128xf32>
    %cst_18 = arith.constant 1.000000e+00 : f32
    %38 = vector.broadcast %cst_18 : f32 to vector<8x128xf32>
    %39 = arith.cmpf olt, %37, %38 : vector<8x128xf32>
    %cst_19 = arith.constant 5.000000e-01 : f32
    %40 = vector.broadcast %cst_19 : f32 to vector<8x128xf32>
    %41 = arith.mulf %40, %36 : vector<8x128xf32>
    %42 = arith.mulf %41, %36 : vector<8x128xf32>
    %cst_20 = arith.constant 5.000000e-01 : f32
    %43 = vector.broadcast %cst_20 : f32 to vector<8x128xf32>
    %44 = arith.subf %37, %43 : vector<8x128xf32>
    %45 = arith.select %39, %42, %44 : vector<8x128xi1>, vector<8x128xf32>
    %46 = arith.addf %31, %45 : vector<8x128xf32>
    %c2 = arith.constant 2 : index
    %c0_21 = arith.constant 0 : index
    %c0_22 = arith.constant 0 : index
    %47 = vector.load %arg3[%c2, %c0_21, %c0_22] : memref<21x8x128xf32, #tpu.memory_space<vmem>>, vector<1x8x128xf32>
    %48 = vector.shape_cast %47 : vector<1x8x128xf32> to vector<8x128xf32>
    %c2_23 = arith.constant 2 : index
    %c0_24 = arith.constant 0 : index
    %c0_25 = arith.constant 0 : index
    %49 = vector.load %arg2[%c2_23, %c0_24, %c0_25] : memref<21x8x128xf32, #tpu.memory_space<vmem>>, vector<1x8x128xf32>
    %50 = vector.shape_cast %49 : vector<1x8x128xf32> to vector<8x128xf32>
    %51 = arith.subf %48, %50 : vector<8x128xf32>
    %52 = math.absf %51 : vector<8x128xf32>
    %cst_26 = arith.constant 1.000000e+00 : f32
    %53 = vector.broadcast %cst_26 : f32 to vector<8x128xf32>
    %54 = arith.cmpf olt, %52, %53 : vector<8x128xf32>
    %cst_27 = arith.constant 5.000000e-01 : f32
    %55 = vector.broadcast %cst_27 : f32 to vector<8x128xf32>
    %56 = arith.mulf %55, %51 : vector<8x128xf32>
    %57 = arith.mulf %56, %51 : vector<8x128xf32>
    %cst_28 = arith.constant 5.000000e-01 : f32
    %58 = vector.broadcast %cst_28 : f32 to vector<8x128xf32>
    %59 = arith.subf %52, %58 : vector<8x128xf32>
    %60 = arith.select %54, %57, %59 : vector<8x128xi1>, vector<8x128xf32>
    %61 = arith.addf %46, %60 : vector<8x128xf32>
    %c3 = arith.constant 3 : index
    %c0_29 = arith.constant 0 : index
    %c0_30 = arith.constant 0 : index
    %62 = vector.load %arg3[%c3, %c0_29, %c0_30] : memref<21x8x128xf32, #tpu.memory_space<vmem>>, vector<1x8x128xf32>
    %63 = vector.shape_cast %62 : vector<1x8x128xf32> to vector<8x128xf32>
    %c3_31 = arith.constant 3 : index
    %c0_32 = arith.constant 0 : index
    %c0_33 = arith.constant 0 : index
    %64 = vector.load %arg2[%c3_31, %c0_32, %c0_33] : memref<21x8x128xf32, #tpu.memory_space<vmem>>, vector<1x8x128xf32>
    %65 = vector.shape_cast %64 : vector<1x8x128xf32> to vector<8x128xf32>
    %66 = arith.subf %63, %65 : vector<8x128xf32>
    %67 = math.absf %66 : vector<8x128xf32>
    %cst_34 = arith.constant 1.000000e+00 : f32
    %68 = vector.broadcast %cst_34 : f32 to vector<8x128xf32>
    %69 = arith.cmpf olt, %67, %68 : vector<8x128xf32>
    %cst_35 = arith.constant 5.000000e-01 : f32
    %70 = vector.broadcast %cst_35 : f32 to vector<8x128xf32>
    %71 = arith.mulf %70, %66 : vector<8x128xf32>
    %72 = arith.mulf %71, %66 : vector<8x128xf32>
    %cst_36 = arith.constant 5.000000e-01 : f32
    %73 = vector.broadcast %cst_36 : f32 to vector<8x128xf32>
    %74 = arith.subf %67, %73 : vector<8x128xf32>
    %75 = arith.select %69, %72, %74 : vector<8x128xi1>, vector<8x128xf32>
    %76 = arith.addf %61, %75 : vector<8x128xf32>
    %c4 = arith.constant 4 : index
    %c0_37 = arith.constant 0 : index
    %c0_38 = arith.constant 0 : index
    %77 = vector.load %arg3[%c4, %c0_37, %c0_38] : memref<21x8x128xf32, #tpu.memory_space<vmem>>, vector<1x8x128xf32>
    %78 = vector.shape_cast %77 : vector<1x8x128xf32> to vector<8x128xf32>
    %c4_39 = arith.constant 4 : index
    %c0_40 = arith.constant 0 : index
    %c0_41 = arith.constant 0 : index
    %79 = vector.load %arg2[%c4_39, %c0_40, %c0_41] : memref<21x8x128xf32, #tpu.memory_space<vmem>>, vector<1x8x128xf32>
    %80 = vector.shape_cast %79 : vector<1x8x128xf32> to vector<8x128xf32>
    %81 = arith.subf %78, %80 : vector<8x128xf32>
    %82 = math.absf %81 : vector<8x128xf32>
    %cst_42 = arith.constant 1.000000e+00 : f32
    %83 = vector.broadcast %cst_42 : f32 to vector<8x128xf32>
    %84 = arith.cmpf olt, %82, %83 : vector<8x128xf32>
    %cst_43 = arith.constant 5.000000e-01 : f32
    %85 = vector.broadcast %cst_43 : f32 to vector<8x128xf32>
    %86 = arith.mulf %85, %81 : vector<8x128xf32>
    %87 = arith.mulf %86, %81 : vector<8x128xf32>
    %cst_44 = arith.constant 5.000000e-01 : f32
    %88 = vector.broadcast %cst_44 : f32 to vector<8x128xf32>
    %89 = arith.subf %82, %88 : vector<8x128xf32>
    %90 = arith.select %84, %87, %89 : vector<8x128xi1>, vector<8x128xf32>
    %91 = arith.addf %76, %90 : vector<8x128xf32>
    %c5 = arith.constant 5 : index
    %c0_45 = arith.constant 0 : index
    %c0_46 = arith.constant 0 : index
    %92 = vector.load %arg3[%c5, %c0_45, %c0_46] : memref<21x8x128xf32, #tpu.memory_space<vmem>>, vector<1x8x128xf32>
    %93 = vector.shape_cast %92 : vector<1x8x128xf32> to vector<8x128xf32>
    %c5_47 = arith.constant 5 : index
    %c0_48 = arith.constant 0 : index
    %c0_49 = arith.constant 0 : index
    %94 = vector.load %arg2[%c5_47, %c0_48, %c0_49] : memref<21x8x128xf32, #tpu.memory_space<vmem>>, vector<1x8x128xf32>
    %95 = vector.shape_cast %94 : vector<1x8x128xf32> to vector<8x128xf32>
    %96 = arith.subf %93, %95 : vector<8x128xf32>
    %97 = math.absf %96 : vector<8x128xf32>
    %cst_50 = arith.constant 1.000000e+00 : f32
    %98 = vector.broadcast %cst_50 : f32 to vector<8x128xf32>
    %99 = arith.cmpf olt, %97, %98 : vector<8x128xf32>
    %cst_51 = arith.constant 5.000000e-01 : f32
    %100 = vector.broadcast %cst_51 : f32 to vector<8x128xf32>
    %101 = arith.mulf %100, %96 : vector<8x128xf32>
    %102 = arith.mulf %101, %96 : vector<8x128xf32>
    %cst_52 = arith.constant 5.000000e-01 : f32
    %103 = vector.broadcast %cst_52 : f32 to vector<8x128xf32>
    %104 = arith.subf %97, %103 : vector<8x128xf32>
    %105 = arith.select %99, %102, %104 : vector<8x128xi1>, vector<8x128xf32>
    %106 = arith.addf %91, %105 : vector<8x128xf32>
    %c6 = arith.constant 6 : index
    %c0_53 = arith.constant 0 : index
    %c0_54 = arith.constant 0 : index
    %107 = vector.load %arg3[%c6, %c0_53, %c0_54] : memref<21x8x128xf32, #tpu.memory_space<vmem>>, vector<1x8x128xf32>
    %108 = vector.shape_cast %107 : vector<1x8x128xf32> to vector<8x128xf32>
    %c6_55 = arith.constant 6 : index
    %c0_56 = arith.constant 0 : index
    %c0_57 = arith.constant 0 : index
    %109 = vector.load %arg2[%c6_55, %c0_56, %c0_57] : memref<21x8x128xf32, #tpu.memory_space<vmem>>, vector<1x8x128xf32>
    %110 = vector.shape_cast %109 : vector<1x8x128xf32> to vector<8x128xf32>
    %111 = arith.subf %108, %110 : vector<8x128xf32>
    %112 = math.absf %111 : vector<8x128xf32>
    %cst_58 = arith.constant 1.000000e+00 : f32
    %113 = vector.broadcast %cst_58 : f32 to vector<8x128xf32>
    %114 = arith.cmpf olt, %112, %113 : vector<8x128xf32>
    %cst_59 = arith.constant 5.000000e-01 : f32
    %115 = vector.broadcast %cst_59 : f32 to vector<8x128xf32>
    %116 = arith.mulf %115, %111 : vector<8x128xf32>
    %117 = arith.mulf %116, %111 : vector<8x128xf32>
    %cst_60 = arith.constant 5.000000e-01 : f32
    %118 = vector.broadcast %cst_60 : f32 to vector<8x128xf32>
    %119 = arith.subf %112, %118 : vector<8x128xf32>
    %120 = arith.select %114, %117, %119 : vector<8x128xi1>, vector<8x128xf32>
    %121 = arith.addf %106, %120 : vector<8x128xf32>
    %c7 = arith.constant 7 : index
    %c0_61 = arith.constant 0 : index
    %c0_62 = arith.constant 0 : index
    %122 = vector.load %arg3[%c7, %c0_61, %c0_62] : memref<21x8x128xf32, #tpu.memory_space<vmem>>, vector<1x8x128xf32>
    %123 = vector.shape_cast %122 : vector<1x8x128xf32> to vector<8x128xf32>
    %c7_63 = arith.constant 7 : index
    %c0_64 = arith.constant 0 : index
    %c0_65 = arith.constant 0 : index
    %124 = vector.load %arg2[%c7_63, %c0_64, %c0_65] : memref<21x8x128xf32, #tpu.memory_space<vmem>>, vector<1x8x128xf32>
    %125 = vector.shape_cast %124 : vector<1x8x128xf32> to vector<8x128xf32>
    %126 = arith.subf %123, %125 : vector<8x128xf32>
    %127 = math.absf %126 : vector<8x128xf32>
    %cst_66 = arith.constant 1.000000e+00 : f32
    %128 = vector.broadcast %cst_66 : f32 to vector<8x128xf32>
    %129 = arith.cmpf olt, %127, %128 : vector<8x128xf32>
    %cst_67 = arith.constant 5.000000e-01 : f32
    %130 = vector.broadcast %cst_67 : f32 to vector<8x128xf32>
    %131 = arith.mulf %130, %126 : vector<8x128xf32>
    %132 = arith.mulf %131, %126 : vector<8x128xf32>
    %cst_68 = arith.constant 5.000000e-01 : f32
    %133 = vector.broadcast %cst_68 : f32 to vector<8x128xf32>
    %134 = arith.subf %127, %133 : vector<8x128xf32>
    %135 = arith.select %129, %132, %134 : vector<8x128xi1>, vector<8x128xf32>
    %136 = arith.addf %121, %135 : vector<8x128xf32>
    %c8 = arith.constant 8 : index
    %c0_69 = arith.constant 0 : index
    %c0_70 = arith.constant 0 : index
    %137 = vector.load %arg3[%c8, %c0_69, %c0_70] : memref<21x8x128xf32, #tpu.memory_space<vmem>>, vector<1x8x128xf32>
    %138 = vector.shape_cast %137 : vector<1x8x128xf32> to vector<8x128xf32>
    %c8_71 = arith.constant 8 : index
    %c0_72 = arith.constant 0 : index
    %c0_73 = arith.constant 0 : index
    %139 = vector.load %arg2[%c8_71, %c0_72, %c0_73] : memref<21x8x128xf32, #tpu.memory_space<vmem>>, vector<1x8x128xf32>
    %140 = vector.shape_cast %139 : vector<1x8x128xf32> to vector<8x128xf32>
    %141 = arith.subf %138, %140 : vector<8x128xf32>
    %142 = math.absf %141 : vector<8x128xf32>
    %cst_74 = arith.constant 1.000000e+00 : f32
    %143 = vector.broadcast %cst_74 : f32 to vector<8x128xf32>
    %144 = arith.cmpf olt, %142, %143 : vector<8x128xf32>
    %cst_75 = arith.constant 5.000000e-01 : f32
    %145 = vector.broadcast %cst_75 : f32 to vector<8x128xf32>
    %146 = arith.mulf %145, %141 : vector<8x128xf32>
    %147 = arith.mulf %146, %141 : vector<8x128xf32>
    %cst_76 = arith.constant 5.000000e-01 : f32
    %148 = vector.broadcast %cst_76 : f32 to vector<8x128xf32>
    %149 = arith.subf %142, %148 : vector<8x128xf32>
    %150 = arith.select %144, %147, %149 : vector<8x128xi1>, vector<8x128xf32>
    %151 = arith.addf %136, %150 : vector<8x128xf32>
    %c9 = arith.constant 9 : index
    %c0_77 = arith.constant 0 : index
    %c0_78 = arith.constant 0 : index
    %152 = vector.load %arg3[%c9, %c0_77, %c0_78] : memref<21x8x128xf32, #tpu.memory_space<vmem>>, vector<1x8x128xf32>
    %153 = vector.shape_cast %152 : vector<1x8x128xf32> to vector<8x128xf32>
    %c9_79 = arith.constant 9 : index
    %c0_80 = arith.constant 0 : index
    %c0_81 = arith.constant 0 : index
    %154 = vector.load %arg2[%c9_79, %c0_80, %c0_81] : memref<21x8x128xf32, #tpu.memory_space<vmem>>, vector<1x8x128xf32>
    %155 = vector.shape_cast %154 : vector<1x8x128xf32> to vector<8x128xf32>
    %156 = arith.subf %153, %155 : vector<8x128xf32>
    %157 = math.absf %156 : vector<8x128xf32>
    %cst_82 = arith.constant 1.000000e+00 : f32
    %158 = vector.broadcast %cst_82 : f32 to vector<8x128xf32>
    %159 = arith.cmpf olt, %157, %158 : vector<8x128xf32>
    %cst_83 = arith.constant 5.000000e-01 : f32
    %160 = vector.broadcast %cst_83 : f32 to vector<8x128xf32>
    %161 = arith.mulf %160, %156 : vector<8x128xf32>
    %162 = arith.mulf %161, %156 : vector<8x128xf32>
    %cst_84 = arith.constant 5.000000e-01 : f32
    %163 = vector.broadcast %cst_84 : f32 to vector<8x128xf32>
    %164 = arith.subf %157, %163 : vector<8x128xf32>
    %165 = arith.select %159, %162, %164 : vector<8x128xi1>, vector<8x128xf32>
    %166 = arith.addf %151, %165 : vector<8x128xf32>
    %c10 = arith.constant 10 : index
    %c0_85 = arith.constant 0 : index
    %c0_86 = arith.constant 0 : index
    %167 = vector.load %arg3[%c10, %c0_85, %c0_86] : memref<21x8x128xf32, #tpu.memory_space<vmem>>, vector<1x8x128xf32>
    %168 = vector.shape_cast %167 : vector<1x8x128xf32> to vector<8x128xf32>
    %c10_87 = arith.constant 10 : index
    %c0_88 = arith.constant 0 : index
    %c0_89 = arith.constant 0 : index
    %169 = vector.load %arg2[%c10_87, %c0_88, %c0_89] : memref<21x8x128xf32, #tpu.memory_space<vmem>>, vector<1x8x128xf32>
    %170 = vector.shape_cast %169 : vector<1x8x128xf32> to vector<8x128xf32>
    %171 = arith.subf %168, %170 : vector<8x128xf32>
    %172 = math.absf %171 : vector<8x128xf32>
    %cst_90 = arith.constant 1.000000e+00 : f32
    %173 = vector.broadcast %cst_90 : f32 to vector<8x128xf32>
    %174 = arith.cmpf olt, %172, %173 : vector<8x128xf32>
    %cst_91 = arith.constant 5.000000e-01 : f32
    %175 = vector.broadcast %cst_91 : f32 to vector<8x128xf32>
    %176 = arith.mulf %175, %171 : vector<8x128xf32>
    %177 = arith.mulf %176, %171 : vector<8x128xf32>
    %cst_92 = arith.constant 5.000000e-01 : f32
    %178 = vector.broadcast %cst_92 : f32 to vector<8x128xf32>
    %179 = arith.subf %172, %178 : vector<8x128xf32>
    %180 = arith.select %174, %177, %179 : vector<8x128xi1>, vector<8x128xf32>
    %181 = arith.addf %166, %180 : vector<8x128xf32>
    %c11 = arith.constant 11 : index
    %c0_93 = arith.constant 0 : index
    %c0_94 = arith.constant 0 : index
    %182 = vector.load %arg3[%c11, %c0_93, %c0_94] : memref<21x8x128xf32, #tpu.memory_space<vmem>>, vector<1x8x128xf32>
    %183 = vector.shape_cast %182 : vector<1x8x128xf32> to vector<8x128xf32>
    %c11_95 = arith.constant 11 : index
    %c0_96 = arith.constant 0 : index
    %c0_97 = arith.constant 0 : index
    %184 = vector.load %arg2[%c11_95, %c0_96, %c0_97] : memref<21x8x128xf32, #tpu.memory_space<vmem>>, vector<1x8x128xf32>
    %185 = vector.shape_cast %184 : vector<1x8x128xf32> to vector<8x128xf32>
    %186 = arith.subf %183, %185 : vector<8x128xf32>
    %187 = math.absf %186 : vector<8x128xf32>
    %cst_98 = arith.constant 1.000000e+00 : f32
    %188 = vector.broadcast %cst_98 : f32 to vector<8x128xf32>
    %189 = arith.cmpf olt, %187, %188 : vector<8x128xf32>
    %cst_99 = arith.constant 5.000000e-01 : f32
    %190 = vector.broadcast %cst_99 : f32 to vector<8x128xf32>
    %191 = arith.mulf %190, %186 : vector<8x128xf32>
    %192 = arith.mulf %191, %186 : vector<8x128xf32>
    %cst_100 = arith.constant 5.000000e-01 : f32
    %193 = vector.broadcast %cst_100 : f32 to vector<8x128xf32>
    %194 = arith.subf %187, %193 : vector<8x128xf32>
    %195 = arith.select %189, %192, %194 : vector<8x128xi1>, vector<8x128xf32>
    %196 = arith.addf %181, %195 : vector<8x128xf32>
    %c12 = arith.constant 12 : index
    %c0_101 = arith.constant 0 : index
    %c0_102 = arith.constant 0 : index
    %197 = vector.load %arg3[%c12, %c0_101, %c0_102] : memref<21x8x128xf32, #tpu.memory_space<vmem>>, vector<1x8x128xf32>
    %198 = vector.shape_cast %197 : vector<1x8x128xf32> to vector<8x128xf32>
    %c12_103 = arith.constant 12 : index
    %c0_104 = arith.constant 0 : index
    %c0_105 = arith.constant 0 : index
    %199 = vector.load %arg2[%c12_103, %c0_104, %c0_105] : memref<21x8x128xf32, #tpu.memory_space<vmem>>, vector<1x8x128xf32>
    %200 = vector.shape_cast %199 : vector<1x8x128xf32> to vector<8x128xf32>
    %201 = arith.subf %198, %200 : vector<8x128xf32>
    %202 = math.absf %201 : vector<8x128xf32>
    %cst_106 = arith.constant 1.000000e+00 : f32
    %203 = vector.broadcast %cst_106 : f32 to vector<8x128xf32>
    %204 = arith.cmpf olt, %202, %203 : vector<8x128xf32>
    %cst_107 = arith.constant 5.000000e-01 : f32
    %205 = vector.broadcast %cst_107 : f32 to vector<8x128xf32>
    %206 = arith.mulf %205, %201 : vector<8x128xf32>
    %207 = arith.mulf %206, %201 : vector<8x128xf32>
    %cst_108 = arith.constant 5.000000e-01 : f32
    %208 = vector.broadcast %cst_108 : f32 to vector<8x128xf32>
    %209 = arith.subf %202, %208 : vector<8x128xf32>
    %210 = arith.select %204, %207, %209 : vector<8x128xi1>, vector<8x128xf32>
    %211 = arith.addf %196, %210 : vector<8x128xf32>
    %c13 = arith.constant 13 : index
    %c0_109 = arith.constant 0 : index
    %c0_110 = arith.constant 0 : index
    %212 = vector.load %arg3[%c13, %c0_109, %c0_110] : memref<21x8x128xf32, #tpu.memory_space<vmem>>, vector<1x8x128xf32>
    %213 = vector.shape_cast %212 : vector<1x8x128xf32> to vector<8x128xf32>
    %c13_111 = arith.constant 13 : index
    %c0_112 = arith.constant 0 : index
    %c0_113 = arith.constant 0 : index
    %214 = vector.load %arg2[%c13_111, %c0_112, %c0_113] : memref<21x8x128xf32, #tpu.memory_space<vmem>>, vector<1x8x128xf32>
    %215 = vector.shape_cast %214 : vector<1x8x128xf32> to vector<8x128xf32>
    %216 = arith.subf %213, %215 : vector<8x128xf32>
    %217 = math.absf %216 : vector<8x128xf32>
    %cst_114 = arith.constant 1.000000e+00 : f32
    %218 = vector.broadcast %cst_114 : f32 to vector<8x128xf32>
    %219 = arith.cmpf olt, %217, %218 : vector<8x128xf32>
    %cst_115 = arith.constant 5.000000e-01 : f32
    %220 = vector.broadcast %cst_115 : f32 to vector<8x128xf32>
    %221 = arith.mulf %220, %216 : vector<8x128xf32>
    %222 = arith.mulf %221, %216 : vector<8x128xf32>
    %cst_116 = arith.constant 5.000000e-01 : f32
    %223 = vector.broadcast %cst_116 : f32 to vector<8x128xf32>
    %224 = arith.subf %217, %223 : vector<8x128xf32>
    %225 = arith.select %219, %222, %224 : vector<8x128xi1>, vector<8x128xf32>
    %226 = arith.addf %211, %225 : vector<8x128xf32>
    %c14 = arith.constant 14 : index
    %c0_117 = arith.constant 0 : index
    %c0_118 = arith.constant 0 : index
    %227 = vector.load %arg3[%c14, %c0_117, %c0_118] : memref<21x8x128xf32, #tpu.memory_space<vmem>>, vector<1x8x128xf32>
    %228 = vector.shape_cast %227 : vector<1x8x128xf32> to vector<8x128xf32>
    %c14_119 = arith.constant 14 : index
    %c0_120 = arith.constant 0 : index
    %c0_121 = arith.constant 0 : index
    %229 = vector.load %arg2[%c14_119, %c0_120, %c0_121] : memref<21x8x128xf32, #tpu.memory_space<vmem>>, vector<1x8x128xf32>
    %230 = vector.shape_cast %229 : vector<1x8x128xf32> to vector<8x128xf32>
    %231 = arith.subf %228, %230 : vector<8x128xf32>
    %232 = math.absf %231 : vector<8x128xf32>
    %cst_122 = arith.constant 1.000000e+00 : f32
    %233 = vector.broadcast %cst_122 : f32 to vector<8x128xf32>
    %234 = arith.cmpf olt, %232, %233 : vector<8x128xf32>
    %cst_123 = arith.constant 5.000000e-01 : f32
    %235 = vector.broadcast %cst_123 : f32 to vector<8x128xf32>
    %236 = arith.mulf %235, %231 : vector<8x128xf32>
    %237 = arith.mulf %236, %231 : vector<8x128xf32>
    %cst_124 = arith.constant 5.000000e-01 : f32
    %238 = vector.broadcast %cst_124 : f32 to vector<8x128xf32>
    %239 = arith.subf %232, %238 : vector<8x128xf32>
    %240 = arith.select %234, %237, %239 : vector<8x128xi1>, vector<8x128xf32>
    %241 = arith.addf %226, %240 : vector<8x128xf32>
    %c15 = arith.constant 15 : index
    %c0_125 = arith.constant 0 : index
    %c0_126 = arith.constant 0 : index
    %242 = vector.load %arg3[%c15, %c0_125, %c0_126] : memref<21x8x128xf32, #tpu.memory_space<vmem>>, vector<1x8x128xf32>
    %243 = vector.shape_cast %242 : vector<1x8x128xf32> to vector<8x128xf32>
    %c15_127 = arith.constant 15 : index
    %c0_128 = arith.constant 0 : index
    %c0_129 = arith.constant 0 : index
    %244 = vector.load %arg2[%c15_127, %c0_128, %c0_129] : memref<21x8x128xf32, #tpu.memory_space<vmem>>, vector<1x8x128xf32>
    %245 = vector.shape_cast %244 : vector<1x8x128xf32> to vector<8x128xf32>
    %246 = arith.subf %243, %245 : vector<8x128xf32>
    %247 = math.absf %246 : vector<8x128xf32>
    %cst_130 = arith.constant 1.000000e+00 : f32
    %248 = vector.broadcast %cst_130 : f32 to vector<8x128xf32>
    %249 = arith.cmpf olt, %247, %248 : vector<8x128xf32>
    %cst_131 = arith.constant 5.000000e-01 : f32
    %250 = vector.broadcast %cst_131 : f32 to vector<8x128xf32>
    %251 = arith.mulf %250, %246 : vector<8x128xf32>
    %252 = arith.mulf %251, %246 : vector<8x128xf32>
    %cst_132 = arith.constant 5.000000e-01 : f32
    %253 = vector.broadcast %cst_132 : f32 to vector<8x128xf32>
    %254 = arith.subf %247, %253 : vector<8x128xf32>
    %255 = arith.select %249, %252, %254 : vector<8x128xi1>, vector<8x128xf32>
    %256 = arith.addf %241, %255 : vector<8x128xf32>
    %c16 = arith.constant 16 : index
    %c0_133 = arith.constant 0 : index
    %c0_134 = arith.constant 0 : index
    %257 = vector.load %arg3[%c16, %c0_133, %c0_134] : memref<21x8x128xf32, #tpu.memory_space<vmem>>, vector<1x8x128xf32>
    %258 = vector.shape_cast %257 : vector<1x8x128xf32> to vector<8x128xf32>
    %c16_135 = arith.constant 16 : index
    %c0_136 = arith.constant 0 : index
    %c0_137 = arith.constant 0 : index
    %259 = vector.load %arg2[%c16_135, %c0_136, %c0_137] : memref<21x8x128xf32, #tpu.memory_space<vmem>>, vector<1x8x128xf32>
    %260 = vector.shape_cast %259 : vector<1x8x128xf32> to vector<8x128xf32>
    %261 = arith.subf %258, %260 : vector<8x128xf32>
    %262 = math.absf %261 : vector<8x128xf32>
    %cst_138 = arith.constant 1.000000e+00 : f32
    %263 = vector.broadcast %cst_138 : f32 to vector<8x128xf32>
    %264 = arith.cmpf olt, %262, %263 : vector<8x128xf32>
    %cst_139 = arith.constant 5.000000e-01 : f32
    %265 = vector.broadcast %cst_139 : f32 to vector<8x128xf32>
    %266 = arith.mulf %265, %261 : vector<8x128xf32>
    %267 = arith.mulf %266, %261 : vector<8x128xf32>
    %cst_140 = arith.constant 5.000000e-01 : f32
    %268 = vector.broadcast %cst_140 : f32 to vector<8x128xf32>
    %269 = arith.subf %262, %268 : vector<8x128xf32>
    %270 = arith.select %264, %267, %269 : vector<8x128xi1>, vector<8x128xf32>
    %271 = arith.addf %256, %270 : vector<8x128xf32>
    %c17 = arith.constant 17 : index
    %c0_141 = arith.constant 0 : index
    %c0_142 = arith.constant 0 : index
    %272 = vector.load %arg3[%c17, %c0_141, %c0_142] : memref<21x8x128xf32, #tpu.memory_space<vmem>>, vector<1x8x128xf32>
    %273 = vector.shape_cast %272 : vector<1x8x128xf32> to vector<8x128xf32>
    %c17_143 = arith.constant 17 : index
    %c0_144 = arith.constant 0 : index
    %c0_145 = arith.constant 0 : index
    %274 = vector.load %arg2[%c17_143, %c0_144, %c0_145] : memref<21x8x128xf32, #tpu.memory_space<vmem>>, vector<1x8x128xf32>
    %275 = vector.shape_cast %274 : vector<1x8x128xf32> to vector<8x128xf32>
    %276 = arith.subf %273, %275 : vector<8x128xf32>
    %277 = math.absf %276 : vector<8x128xf32>
    %cst_146 = arith.constant 1.000000e+00 : f32
    %278 = vector.broadcast %cst_146 : f32 to vector<8x128xf32>
    %279 = arith.cmpf olt, %277, %278 : vector<8x128xf32>
    %cst_147 = arith.constant 5.000000e-01 : f32
    %280 = vector.broadcast %cst_147 : f32 to vector<8x128xf32>
    %281 = arith.mulf %280, %276 : vector<8x128xf32>
    %282 = arith.mulf %281, %276 : vector<8x128xf32>
    %cst_148 = arith.constant 5.000000e-01 : f32
    %283 = vector.broadcast %cst_148 : f32 to vector<8x128xf32>
    %284 = arith.subf %277, %283 : vector<8x128xf32>
    %285 = arith.select %279, %282, %284 : vector<8x128xi1>, vector<8x128xf32>
    %286 = arith.addf %271, %285 : vector<8x128xf32>
    %c18 = arith.constant 18 : index
    %c0_149 = arith.constant 0 : index
    %c0_150 = arith.constant 0 : index
    %287 = vector.load %arg3[%c18, %c0_149, %c0_150] : memref<21x8x128xf32, #tpu.memory_space<vmem>>, vector<1x8x128xf32>
    %288 = vector.shape_cast %287 : vector<1x8x128xf32> to vector<8x128xf32>
    %c18_151 = arith.constant 18 : index
    %c0_152 = arith.constant 0 : index
    %c0_153 = arith.constant 0 : index
    %289 = vector.load %arg2[%c18_151, %c0_152, %c0_153] : memref<21x8x128xf32, #tpu.memory_space<vmem>>, vector<1x8x128xf32>
    %290 = vector.shape_cast %289 : vector<1x8x128xf32> to vector<8x128xf32>
    %291 = arith.subf %288, %290 : vector<8x128xf32>
    %292 = math.absf %291 : vector<8x128xf32>
    %cst_154 = arith.constant 1.000000e+00 : f32
    %293 = vector.broadcast %cst_154 : f32 to vector<8x128xf32>
    %294 = arith.cmpf olt, %292, %293 : vector<8x128xf32>
    %cst_155 = arith.constant 5.000000e-01 : f32
    %295 = vector.broadcast %cst_155 : f32 to vector<8x128xf32>
    %296 = arith.mulf %295, %291 : vector<8x128xf32>
    %297 = arith.mulf %296, %291 : vector<8x128xf32>
    %cst_156 = arith.constant 5.000000e-01 : f32
    %298 = vector.broadcast %cst_156 : f32 to vector<8x128xf32>
    %299 = arith.subf %292, %298 : vector<8x128xf32>
    %300 = arith.select %294, %297, %299 : vector<8x128xi1>, vector<8x128xf32>
    %301 = arith.addf %286, %300 : vector<8x128xf32>
    %c19 = arith.constant 19 : index
    %c0_157 = arith.constant 0 : index
    %c0_158 = arith.constant 0 : index
    %302 = vector.load %arg3[%c19, %c0_157, %c0_158] : memref<21x8x128xf32, #tpu.memory_space<vmem>>, vector<1x8x128xf32>
    %303 = vector.shape_cast %302 : vector<1x8x128xf32> to vector<8x128xf32>
    %c19_159 = arith.constant 19 : index
    %c0_160 = arith.constant 0 : index
    %c0_161 = arith.constant 0 : index
    %304 = vector.load %arg2[%c19_159, %c0_160, %c0_161] : memref<21x8x128xf32, #tpu.memory_space<vmem>>, vector<1x8x128xf32>
    %305 = vector.shape_cast %304 : vector<1x8x128xf32> to vector<8x128xf32>
    %306 = arith.subf %303, %305 : vector<8x128xf32>
    %307 = math.absf %306 : vector<8x128xf32>
    %cst_162 = arith.constant 1.000000e+00 : f32
    %308 = vector.broadcast %cst_162 : f32 to vector<8x128xf32>
    %309 = arith.cmpf olt, %307, %308 : vector<8x128xf32>
    %cst_163 = arith.constant 5.000000e-01 : f32
    %310 = vector.broadcast %cst_163 : f32 to vector<8x128xf32>
    %311 = arith.mulf %310, %306 : vector<8x128xf32>
    %312 = arith.mulf %311, %306 : vector<8x128xf32>
    %cst_164 = arith.constant 5.000000e-01 : f32
    %313 = vector.broadcast %cst_164 : f32 to vector<8x128xf32>
    %314 = arith.subf %307, %313 : vector<8x128xf32>
    %315 = arith.select %309, %312, %314 : vector<8x128xi1>, vector<8x128xf32>
    %316 = arith.addf %301, %315 : vector<8x128xf32>
    %c20 = arith.constant 20 : index
    %c0_165 = arith.constant 0 : index
    %c0_166 = arith.constant 0 : index
    %317 = vector.load %arg3[%c20, %c0_165, %c0_166] : memref<21x8x128xf32, #tpu.memory_space<vmem>>, vector<1x8x128xf32>
    %318 = vector.shape_cast %317 : vector<1x8x128xf32> to vector<8x128xf32>
    %c20_167 = arith.constant 20 : index
    %c0_168 = arith.constant 0 : index
    %c0_169 = arith.constant 0 : index
    %319 = vector.load %arg2[%c20_167, %c0_168, %c0_169] : memref<21x8x128xf32, #tpu.memory_space<vmem>>, vector<1x8x128xf32>
    %320 = vector.shape_cast %319 : vector<1x8x128xf32> to vector<8x128xf32>
    %321 = arith.subf %318, %320 : vector<8x128xf32>
    %322 = math.absf %321 : vector<8x128xf32>
    %cst_170 = arith.constant 1.000000e+00 : f32
    %323 = vector.broadcast %cst_170 : f32 to vector<8x128xf32>
    %324 = arith.cmpf olt, %322, %323 : vector<8x128xf32>
    %cst_171 = arith.constant 5.000000e-01 : f32
    %325 = vector.broadcast %cst_171 : f32 to vector<8x128xf32>
    %326 = arith.mulf %325, %321 : vector<8x128xf32>
    %327 = arith.mulf %326, %321 : vector<8x128xf32>
    %cst_172 = arith.constant 5.000000e-01 : f32
    %328 = vector.broadcast %cst_172 : f32 to vector<8x128xf32>
    %329 = arith.subf %322, %328 : vector<8x128xf32>
    %330 = arith.select %324, %327, %329 : vector<8x128xi1>, vector<8x128xf32>
    %331 = arith.addf %316, %330 : vector<8x128xf32>
    %c0_173 = arith.constant 0 : index
    %c0_174 = arith.constant 0 : index
    %c0_175 = arith.constant 0 : index
    %332 = vector.load %arg3[%c0_173, %c0_174, %c0_175] : memref<21x8x128xf32, #tpu.memory_space<vmem>>, vector<1x8x128xf32>
    %333 = vector.shape_cast %332 : vector<1x8x128xf32> to vector<8x128xf32>
    %cst_176 = arith.constant 9.99999974E-6 : f32
    %334 = vector.broadcast %cst_176 : f32 to vector<8x128xf32>
    %335 = arith.addf %333, %334 : vector<8x128xf32>
    %336 = math.rsqrt %335 : vector<8x128xf32>
    %337 = arith.mulf %335, %336 : vector<8x128xf32>
    %338 = math.log %335 : vector<8x128xf32>
    %cst_177 = arith.constant 5.000000e-01 : f32
    %339 = vector.broadcast %cst_177 : f32 to vector<8x128xf32>
    %340 = arith.mulf %339, %338 : vector<8x128xf32>
    %c1_178 = arith.constant 1 : index
    %c0_179 = arith.constant 0 : index
    %c0_180 = arith.constant 0 : index
    %341 = vector.load %arg3[%c1_178, %c0_179, %c0_180] : memref<21x8x128xf32, #tpu.memory_space<vmem>>, vector<1x8x128xf32>
    %342 = vector.shape_cast %341 : vector<1x8x128xf32> to vector<8x128xf32>
    %343 = arith.mulf %342, %336 : vector<8x128xf32>
    %c2_181 = arith.constant 2 : index
    %c0_182 = arith.constant 0 : index
    %c0_183 = arith.constant 0 : index
    %344 = vector.load %arg3[%c2_181, %c0_182, %c0_183] : memref<21x8x128xf32, #tpu.memory_space<vmem>>, vector<1x8x128xf32>
    %345 = vector.shape_cast %344 : vector<1x8x128xf32> to vector<8x128xf32>
    %346 = arith.mulf %345, %336 : vector<8x128xf32>
    %c3_184 = arith.constant 3 : index
    %c0_185 = arith.constant 0 : index
    %c0_186 = arith.constant 0 : index
    %347 = vector.load %arg3[%c3_184, %c0_185, %c0_186] : memref<21x8x128xf32, #tpu.memory_space<vmem>>, vector<1x8x128xf32>
    %348 = vector.shape_cast %347 : vector<1x8x128xf32> to vector<8x128xf32>
    %349 = arith.mulf %348, %336 : vector<8x128xf32>
    %c4_187 = arith.constant 4 : index
    %c0_188 = arith.constant 0 : index
    %c0_189 = arith.constant 0 : index
    %350 = vector.load %arg3[%c4_187, %c0_188, %c0_189] : memref<21x8x128xf32, #tpu.memory_space<vmem>>, vector<1x8x128xf32>
    %351 = vector.shape_cast %350 : vector<1x8x128xf32> to vector<8x128xf32>
    %352 = arith.mulf %351, %336 : vector<8x128xf32>
    %c5_190 = arith.constant 5 : index
    %c0_191 = arith.constant 0 : index
    %c0_192 = arith.constant 0 : index
    %353 = vector.load %arg3[%c5_190, %c0_191, %c0_192] : memref<21x8x128xf32, #tpu.memory_space<vmem>>, vector<1x8x128xf32>
    %354 = vector.shape_cast %353 : vector<1x8x128xf32> to vector<8x128xf32>
    %355 = arith.mulf %354, %336 : vector<8x128xf32>
    %c6_193 = arith.constant 6 : index
    %c0_194 = arith.constant 0 : index
    %c0_195 = arith.constant 0 : index
    %356 = vector.load %arg3[%c6_193, %c0_194, %c0_195] : memref<21x8x128xf32, #tpu.memory_space<vmem>>, vector<1x8x128xf32>
    %357 = vector.shape_cast %356 : vector<1x8x128xf32> to vector<8x128xf32>
    %cst_196 = arith.constant 9.99999974E-6 : f32
    %358 = vector.broadcast %cst_196 : f32 to vector<8x128xf32>
    %359 = arith.addf %357, %358 : vector<8x128xf32>
    %360 = arith.mulf %343, %343 : vector<8x128xf32>
    %361 = arith.subf %359, %360 : vector<8x128xf32>
    %362 = math.rsqrt %361 : vector<8x128xf32>
    %363 = arith.mulf %361, %362 : vector<8x128xf32>
    %364 = math.log %361 : vector<8x128xf32>
    %cst_197 = arith.constant 5.000000e-01 : f32
    %365 = vector.broadcast %cst_197 : f32 to vector<8x128xf32>
    %366 = arith.mulf %365, %364 : vector<8x128xf32>
    %367 = arith.addf %340, %366 : vector<8x128xf32>
    %c7_198 = arith.constant 7 : index
    %c0_199 = arith.constant 0 : index
    %c0_200 = arith.constant 0 : index
    %368 = vector.load %arg3[%c7_198, %c0_199, %c0_200] : memref<21x8x128xf32, #tpu.memory_space<vmem>>, vector<1x8x128xf32>
    %369 = vector.shape_cast %368 : vector<1x8x128xf32> to vector<8x128xf32>
    %370 = arith.mulf %346, %343 : vector<8x128xf32>
    %371 = arith.subf %369, %370 : vector<8x128xf32>
    %372 = arith.mulf %371, %362 : vector<8x128xf32>
    %c8_201 = arith.constant 8 : index
    %c0_202 = arith.constant 0 : index
    %c0_203 = arith.constant 0 : index
    %373 = vector.load %arg3[%c8_201, %c0_202, %c0_203] : memref<21x8x128xf32, #tpu.memory_space<vmem>>, vector<1x8x128xf32>
    %374 = vector.shape_cast %373 : vector<1x8x128xf32> to vector<8x128xf32>
    %375 = arith.mulf %349, %343 : vector<8x128xf32>
    %376 = arith.subf %374, %375 : vector<8x128xf32>
    %377 = arith.mulf %376, %362 : vector<8x128xf32>
    %c9_204 = arith.constant 9 : index
    %c0_205 = arith.constant 0 : index
    %c0_206 = arith.constant 0 : index
    %378 = vector.load %arg3[%c9_204, %c0_205, %c0_206] : memref<21x8x128xf32, #tpu.memory_space<vmem>>, vector<1x8x128xf32>
    %379 = vector.shape_cast %378 : vector<1x8x128xf32> to vector<8x128xf32>
    %380 = arith.mulf %352, %343 : vector<8x128xf32>
    %381 = arith.subf %379, %380 : vector<8x128xf32>
    %382 = arith.mulf %381, %362 : vector<8x128xf32>
    %c10_207 = arith.constant 10 : index
    %c0_208 = arith.constant 0 : index
    %c0_209 = arith.constant 0 : index
    %383 = vector.load %arg3[%c10_207, %c0_208, %c0_209] : memref<21x8x128xf32, #tpu.memory_space<vmem>>, vector<1x8x128xf32>
    %384 = vector.shape_cast %383 : vector<1x8x128xf32> to vector<8x128xf32>
    %385 = arith.mulf %355, %343 : vector<8x128xf32>
    %386 = arith.subf %384, %385 : vector<8x128xf32>
    %387 = arith.mulf %386, %362 : vector<8x128xf32>
    %c11_210 = arith.constant 11 : index
    %c0_211 = arith.constant 0 : index
    %c0_212 = arith.constant 0 : index
    %388 = vector.load %arg3[%c11_210, %c0_211, %c0_212] : memref<21x8x128xf32, #tpu.memory_space<vmem>>, vector<1x8x128xf32>
    %389 = vector.shape_cast %388 : vector<1x8x128xf32> to vector<8x128xf32>
    %cst_213 = arith.constant 9.99999974E-6 : f32
    %390 = vector.broadcast %cst_213 : f32 to vector<8x128xf32>
    %391 = arith.addf %389, %390 : vector<8x128xf32>
    %392 = arith.mulf %346, %346 : vector<8x128xf32>
    %393 = arith.subf %391, %392 : vector<8x128xf32>
    %394 = arith.mulf %372, %372 : vector<8x128xf32>
    %395 = arith.subf %393, %394 : vector<8x128xf32>
    %396 = math.rsqrt %395 : vector<8x128xf32>
    %397 = arith.mulf %395, %396 : vector<8x128xf32>
    %398 = math.log %395 : vector<8x128xf32>
    %cst_214 = arith.constant 5.000000e-01 : f32
    %399 = vector.broadcast %cst_214 : f32 to vector<8x128xf32>
    %400 = arith.mulf %399, %398 : vector<8x128xf32>
    %401 = arith.addf %367, %400 : vector<8x128xf32>
    %c12_215 = arith.constant 12 : index
    %c0_216 = arith.constant 0 : index
    %c0_217 = arith.constant 0 : index
    %402 = vector.load %arg3[%c12_215, %c0_216, %c0_217] : memref<21x8x128xf32, #tpu.memory_space<vmem>>, vector<1x8x128xf32>
    %403 = vector.shape_cast %402 : vector<1x8x128xf32> to vector<8x128xf32>
    %404 = arith.mulf %349, %346 : vector<8x128xf32>
    %405 = arith.subf %403, %404 : vector<8x128xf32>
    %406 = arith.mulf %377, %372 : vector<8x128xf32>
    %407 = arith.subf %405, %406 : vector<8x128xf32>
    %408 = arith.mulf %407, %396 : vector<8x128xf32>
    %c13_218 = arith.constant 13 : index
    %c0_219 = arith.constant 0 : index
    %c0_220 = arith.constant 0 : index
    %409 = vector.load %arg3[%c13_218, %c0_219, %c0_220] : memref<21x8x128xf32, #tpu.memory_space<vmem>>, vector<1x8x128xf32>
    %410 = vector.shape_cast %409 : vector<1x8x128xf32> to vector<8x128xf32>
    %411 = arith.mulf %352, %346 : vector<8x128xf32>
    %412 = arith.subf %410, %411 : vector<8x128xf32>
    %413 = arith.mulf %382, %372 : vector<8x128xf32>
    %414 = arith.subf %412, %413 : vector<8x128xf32>
    %415 = arith.mulf %414, %396 : vector<8x128xf32>
    %c14_221 = arith.constant 14 : index
    %c0_222 = arith.constant 0 : index
    %c0_223 = arith.constant 0 : index
    %416 = vector.load %arg3[%c14_221, %c0_222, %c0_223] : memref<21x8x128xf32, #tpu.memory_space<vmem>>, vector<1x8x128xf32>
    %417 = vector.shape_cast %416 : vector<1x8x128xf32> to vector<8x128xf32>
    %418 = arith.mulf %355, %346 : vector<8x128xf32>
    %419 = arith.subf %417, %418 : vector<8x128xf32>
    %420 = arith.mulf %387, %372 : vector<8x128xf32>
    %421 = arith.subf %419, %420 : vector<8x128xf32>
    %422 = arith.mulf %421, %396 : vector<8x128xf32>
    %c15_224 = arith.constant 15 : index
    %c0_225 = arith.constant 0 : index
    %c0_226 = arith.constant 0 : index
    %423 = vector.load %arg3[%c15_224, %c0_225, %c0_226] : memref<21x8x128xf32, #tpu.memory_space<vmem>>, vector<1x8x128xf32>
    %424 = vector.shape_cast %423 : vector<1x8x128xf32> to vector<8x128xf32>
    %cst_227 = arith.constant 9.99999974E-6 : f32
    %425 = vector.broadcast %cst_227 : f32 to vector<8x128xf32>
    %426 = arith.addf %424, %425 : vector<8x128xf32>
    %427 = arith.mulf %349, %349 : vector<8x128xf32>
    %428 = arith.subf %426, %427 : vector<8x128xf32>
    %429 = arith.mulf %377, %377 : vector<8x128xf32>
    %430 = arith.subf %428, %429 : vector<8x128xf32>
    %431 = arith.mulf %408, %408 : vector<8x128xf32>
    %432 = arith.subf %430, %431 : vector<8x128xf32>
    %433 = math.rsqrt %432 : vector<8x128xf32>
    %434 = arith.mulf %432, %433 : vector<8x128xf32>
    %435 = math.log %432 : vector<8x128xf32>
    %cst_228 = arith.constant 5.000000e-01 : f32
    %436 = vector.broadcast %cst_228 : f32 to vector<8x128xf32>
    %437 = arith.mulf %436, %435 : vector<8x128xf32>
    %438 = arith.addf %401, %437 : vector<8x128xf32>
    %c16_229 = arith.constant 16 : index
    %c0_230 = arith.constant 0 : index
    %c0_231 = arith.constant 0 : index
    %439 = vector.load %arg3[%c16_229, %c0_230, %c0_231] : memref<21x8x128xf32, #tpu.memory_space<vmem>>, vector<1x8x128xf32>
    %440 = vector.shape_cast %439 : vector<1x8x128xf32> to vector<8x128xf32>
    %441 = arith.mulf %352, %349 : vector<8x128xf32>
    %442 = arith.subf %440, %441 : vector<8x128xf32>
    %443 = arith.mulf %382, %377 : vector<8x128xf32>
    %444 = arith.subf %442, %443 : vector<8x128xf32>
    %445 = arith.mulf %415, %408 : vector<8x128xf32>
    %446 = arith.subf %444, %445 : vector<8x128xf32>
    %447 = arith.mulf %446, %433 : vector<8x128xf32>
    %c17_232 = arith.constant 17 : index
    %c0_233 = arith.constant 0 : index
    %c0_234 = arith.constant 0 : index
    %448 = vector.load %arg3[%c17_232, %c0_233, %c0_234] : memref<21x8x128xf32, #tpu.memory_space<vmem>>, vector<1x8x128xf32>
    %449 = vector.shape_cast %448 : vector<1x8x128xf32> to vector<8x128xf32>
    %450 = arith.mulf %355, %349 : vector<8x128xf32>
    %451 = arith.subf %449, %450 : vector<8x128xf32>
    %452 = arith.mulf %387, %377 : vector<8x128xf32>
    %453 = arith.subf %451, %452 : vector<8x128xf32>
    %454 = arith.mulf %422, %408 : vector<8x128xf32>
    %455 = arith.subf %453, %454 : vector<8x128xf32>
    %456 = arith.mulf %455, %433 : vector<8x128xf32>
    %c18_235 = arith.constant 18 : index
    %c0_236 = arith.constant 0 : index
    %c0_237 = arith.constant 0 : index
    %457 = vector.load %arg3[%c18_235, %c0_236, %c0_237] : memref<21x8x128xf32, #tpu.memory_space<vmem>>, vector<1x8x128xf32>
    %458 = vector.shape_cast %457 : vector<1x8x128xf32> to vector<8x128xf32>
    %cst_238 = arith.constant 9.99999974E-6 : f32
    %459 = vector.broadcast %cst_238 : f32 to vector<8x128xf32>
    %460 = arith.addf %458, %459 : vector<8x128xf32>
    %461 = arith.mulf %352, %352 : vector<8x128xf32>
    %462 = arith.subf %460, %461 : vector<8x128xf32>
    %463 = arith.mulf %382, %382 : vector<8x128xf32>
    %464 = arith.subf %462, %463 : vector<8x128xf32>
    %465 = arith.mulf %415, %415 : vector<8x128xf32>
    %466 = arith.subf %464, %465 : vector<8x128xf32>
    %467 = arith.mulf %447, %447 : vector<8x128xf32>
    %468 = arith.subf %466, %467 : vector<8x128xf32>
    %469 = math.rsqrt %468 : vector<8x128xf32>
    %470 = arith.mulf %468, %469 : vector<8x128xf32>
    %471 = math.log %468 : vector<8x128xf32>
    %cst_239 = arith.constant 5.000000e-01 : f32
    %472 = vector.broadcast %cst_239 : f32 to vector<8x128xf32>
    %473 = arith.mulf %472, %471 : vector<8x128xf32>
    %474 = arith.addf %438, %473 : vector<8x128xf32>
    %c19_240 = arith.constant 19 : index
    %c0_241 = arith.constant 0 : index
    %c0_242 = arith.constant 0 : index
    %475 = vector.load %arg3[%c19_240, %c0_241, %c0_242] : memref<21x8x128xf32, #tpu.memory_space<vmem>>, vector<1x8x128xf32>
    %476 = vector.shape_cast %475 : vector<1x8x128xf32> to vector<8x128xf32>
    %477 = arith.mulf %355, %352 : vector<8x128xf32>
    %478 = arith.subf %476, %477 : vector<8x128xf32>
    %479 = arith.mulf %387, %382 : vector<8x128xf32>
    %480 = arith.subf %478, %479 : vector<8x128xf32>
    %481 = arith.mulf %422, %415 : vector<8x128xf32>
    %482 = arith.subf %480, %481 : vector<8x128xf32>
    %483 = arith.mulf %456, %447 : vector<8x128xf32>
    %484 = arith.subf %482, %483 : vector<8x128xf32>
    %485 = arith.mulf %484, %469 : vector<8x128xf32>
    %c20_243 = arith.constant 20 : index
    %c0_244 = arith.constant 0 : index
    %c0_245 = arith.constant 0 : index
    %486 = vector.load %arg3[%c20_243, %c0_244, %c0_245] : memref<21x8x128xf32, #tpu.memory_space<vmem>>, vector<1x8x128xf32>
    %487 = vector.shape_cast %486 : vector<1x8x128xf32> to vector<8x128xf32>
    %cst_246 = arith.constant 9.99999974E-6 : f32
    %488 = vector.broadcast %cst_246 : f32 to vector<8x128xf32>
    %489 = arith.addf %487, %488 : vector<8x128xf32>
    %490 = arith.mulf %355, %355 : vector<8x128xf32>
    %491 = arith.subf %489, %490 : vector<8x128xf32>
    %492 = arith.mulf %387, %387 : vector<8x128xf32>
    %493 = arith.subf %491, %492 : vector<8x128xf32>
    %494 = arith.mulf %422, %422 : vector<8x128xf32>
    %495 = arith.subf %493, %494 : vector<8x128xf32>
    %496 = arith.mulf %456, %456 : vector<8x128xf32>
    %497 = arith.subf %495, %496 : vector<8x128xf32>
    %498 = arith.mulf %485, %485 : vector<8x128xf32>
    %499 = arith.subf %497, %498 : vector<8x128xf32>
    %500 = math.rsqrt %499 : vector<8x128xf32>
    %501 = arith.mulf %499, %500 : vector<8x128xf32>
    %502 = math.log %499 : vector<8x128xf32>
    %cst_247 = arith.constant 5.000000e-01 : f32
    %503 = vector.broadcast %cst_247 : f32 to vector<8x128xf32>
    %504 = arith.mulf %503, %502 : vector<8x128xf32>
    %505 = arith.addf %474, %504 : vector<8x128xf32>
    %c0_248 = arith.constant 0 : index
    %c0_249 = arith.constant 0 : index
    %c0_250 = arith.constant 0 : index
    %506 = vector.load %arg2[%c0_248, %c0_249, %c0_250] : memref<21x8x128xf32, #tpu.memory_space<vmem>>, vector<1x8x128xf32>
    %507 = vector.shape_cast %506 : vector<1x8x128xf32> to vector<8x128xf32>
    %cst_251 = arith.constant 9.99999974E-6 : f32
    %508 = vector.broadcast %cst_251 : f32 to vector<8x128xf32>
    %509 = arith.addf %507, %508 : vector<8x128xf32>
    %510 = math.rsqrt %509 : vector<8x128xf32>
    %511 = math.log %509 : vector<8x128xf32>
    %cst_252 = arith.constant 5.000000e-01 : f32
    %512 = vector.broadcast %cst_252 : f32 to vector<8x128xf32>
    %513 = arith.mulf %512, %511 : vector<8x128xf32>
    %c1_253 = arith.constant 1 : index
    %c0_254 = arith.constant 0 : index
    %c0_255 = arith.constant 0 : index
    %514 = vector.load %arg2[%c1_253, %c0_254, %c0_255] : memref<21x8x128xf32, #tpu.memory_space<vmem>>, vector<1x8x128xf32>
    %515 = vector.shape_cast %514 : vector<1x8x128xf32> to vector<8x128xf32>
    %516 = arith.mulf %515, %510 : vector<8x128xf32>
    %c2_256 = arith.constant 2 : index
    %c0_257 = arith.constant 0 : index
    %c0_258 = arith.constant 0 : index
    %517 = vector.load %arg2[%c2_256, %c0_257, %c0_258] : memref<21x8x128xf32, #tpu.memory_space<vmem>>, vector<1x8x128xf32>
    %518 = vector.shape_cast %517 : vector<1x8x128xf32> to vector<8x128xf32>
    %519 = arith.mulf %518, %510 : vector<8x128xf32>
    %c3_259 = arith.constant 3 : index
    %c0_260 = arith.constant 0 : index
    %c0_261 = arith.constant 0 : index
    %520 = vector.load %arg2[%c3_259, %c0_260, %c0_261] : memref<21x8x128xf32, #tpu.memory_space<vmem>>, vector<1x8x128xf32>
    %521 = vector.shape_cast %520 : vector<1x8x128xf32> to vector<8x128xf32>
    %522 = arith.mulf %521, %510 : vector<8x128xf32>
    %c4_262 = arith.constant 4 : index
    %c0_263 = arith.constant 0 : index
    %c0_264 = arith.constant 0 : index
    %523 = vector.load %arg2[%c4_262, %c0_263, %c0_264] : memref<21x8x128xf32, #tpu.memory_space<vmem>>, vector<1x8x128xf32>
    %524 = vector.shape_cast %523 : vector<1x8x128xf32> to vector<8x128xf32>
    %525 = arith.mulf %524, %510 : vector<8x128xf32>
    %c5_265 = arith.constant 5 : index
    %c0_266 = arith.constant 0 : index
    %c0_267 = arith.constant 0 : index
    %526 = vector.load %arg2[%c5_265, %c0_266, %c0_267] : memref<21x8x128xf32, #tpu.memory_space<vmem>>, vector<1x8x128xf32>
    %527 = vector.shape_cast %526 : vector<1x8x128xf32> to vector<8x128xf32>
    %528 = arith.mulf %527, %510 : vector<8x128xf32>
    %c6_268 = arith.constant 6 : index
    %c0_269 = arith.constant 0 : index
    %c0_270 = arith.constant 0 : index
    %529 = vector.load %arg2[%c6_268, %c0_269, %c0_270] : memref<21x8x128xf32, #tpu.memory_space<vmem>>, vector<1x8x128xf32>
    %530 = vector.shape_cast %529 : vector<1x8x128xf32> to vector<8x128xf32>
    %cst_271 = arith.constant 9.99999974E-6 : f32
    %531 = vector.broadcast %cst_271 : f32 to vector<8x128xf32>
    %532 = arith.addf %530, %531 : vector<8x128xf32>
    %533 = arith.mulf %516, %516 : vector<8x128xf32>
    %534 = arith.subf %532, %533 : vector<8x128xf32>
    %535 = math.rsqrt %534 : vector<8x128xf32>
    %536 = math.log %534 : vector<8x128xf32>
    %cst_272 = arith.constant 5.000000e-01 : f32
    %537 = vector.broadcast %cst_272 : f32 to vector<8x128xf32>
    %538 = arith.mulf %537, %536 : vector<8x128xf32>
    %539 = arith.addf %513, %538 : vector<8x128xf32>
    %c7_273 = arith.constant 7 : index
    %c0_274 = arith.constant 0 : index
    %c0_275 = arith.constant 0 : index
    %540 = vector.load %arg2[%c7_273, %c0_274, %c0_275] : memref<21x8x128xf32, #tpu.memory_space<vmem>>, vector<1x8x128xf32>
    %541 = vector.shape_cast %540 : vector<1x8x128xf32> to vector<8x128xf32>
    %542 = arith.mulf %519, %516 : vector<8x128xf32>
    %543 = arith.subf %541, %542 : vector<8x128xf32>
    %544 = arith.mulf %543, %535 : vector<8x128xf32>
    %c8_276 = arith.constant 8 : index
    %c0_277 = arith.constant 0 : index
    %c0_278 = arith.constant 0 : index
    %545 = vector.load %arg2[%c8_276, %c0_277, %c0_278] : memref<21x8x128xf32, #tpu.memory_space<vmem>>, vector<1x8x128xf32>
    %546 = vector.shape_cast %545 : vector<1x8x128xf32> to vector<8x128xf32>
    %547 = arith.mulf %522, %516 : vector<8x128xf32>
    %548 = arith.subf %546, %547 : vector<8x128xf32>
    %549 = arith.mulf %548, %535 : vector<8x128xf32>
    %c9_279 = arith.constant 9 : index
    %c0_280 = arith.constant 0 : index
    %c0_281 = arith.constant 0 : index
    %550 = vector.load %arg2[%c9_279, %c0_280, %c0_281] : memref<21x8x128xf32, #tpu.memory_space<vmem>>, vector<1x8x128xf32>
    %551 = vector.shape_cast %550 : vector<1x8x128xf32> to vector<8x128xf32>
    %552 = arith.mulf %525, %516 : vector<8x128xf32>
    %553 = arith.subf %551, %552 : vector<8x128xf32>
    %554 = arith.mulf %553, %535 : vector<8x128xf32>
    %c10_282 = arith.constant 10 : index
    %c0_283 = arith.constant 0 : index
    %c0_284 = arith.constant 0 : index
    %555 = vector.load %arg2[%c10_282, %c0_283, %c0_284] : memref<21x8x128xf32, #tpu.memory_space<vmem>>, vector<1x8x128xf32>
    %556 = vector.shape_cast %555 : vector<1x8x128xf32> to vector<8x128xf32>
    %557 = arith.mulf %528, %516 : vector<8x128xf32>
    %558 = arith.subf %556, %557 : vector<8x128xf32>
    %559 = arith.mulf %558, %535 : vector<8x128xf32>
    %c11_285 = arith.constant 11 : index
    %c0_286 = arith.constant 0 : index
    %c0_287 = arith.constant 0 : index
    %560 = vector.load %arg2[%c11_285, %c0_286, %c0_287] : memref<21x8x128xf32, #tpu.memory_space<vmem>>, vector<1x8x128xf32>
    %561 = vector.shape_cast %560 : vector<1x8x128xf32> to vector<8x128xf32>
    %cst_288 = arith.constant 9.99999974E-6 : f32
    %562 = vector.broadcast %cst_288 : f32 to vector<8x128xf32>
    %563 = arith.addf %561, %562 : vector<8x128xf32>
    %564 = arith.mulf %519, %519 : vector<8x128xf32>
    %565 = arith.subf %563, %564 : vector<8x128xf32>
    %566 = arith.mulf %544, %544 : vector<8x128xf32>
    %567 = arith.subf %565, %566 : vector<8x128xf32>
    %568 = math.rsqrt %567 : vector<8x128xf32>
    %569 = math.log %567 : vector<8x128xf32>
    %cst_289 = arith.constant 5.000000e-01 : f32
    %570 = vector.broadcast %cst_289 : f32 to vector<8x128xf32>
    %571 = arith.mulf %570, %569 : vector<8x128xf32>
    %572 = arith.addf %539, %571 : vector<8x128xf32>
    %c12_290 = arith.constant 12 : index
    %c0_291 = arith.constant 0 : index
    %c0_292 = arith.constant 0 : index
    %573 = vector.load %arg2[%c12_290, %c0_291, %c0_292] : memref<21x8x128xf32, #tpu.memory_space<vmem>>, vector<1x8x128xf32>
    %574 = vector.shape_cast %573 : vector<1x8x128xf32> to vector<8x128xf32>
    %575 = arith.mulf %522, %519 : vector<8x128xf32>
    %576 = arith.subf %574, %575 : vector<8x128xf32>
    %577 = arith.mulf %549, %544 : vector<8x128xf32>
    %578 = arith.subf %576, %577 : vector<8x128xf32>
    %579 = arith.mulf %578, %568 : vector<8x128xf32>
    %c13_293 = arith.constant 13 : index
    %c0_294 = arith.constant 0 : index
    %c0_295 = arith.constant 0 : index
    %580 = vector.load %arg2[%c13_293, %c0_294, %c0_295] : memref<21x8x128xf32, #tpu.memory_space<vmem>>, vector<1x8x128xf32>
    %581 = vector.shape_cast %580 : vector<1x8x128xf32> to vector<8x128xf32>
    %582 = arith.mulf %525, %519 : vector<8x128xf32>
    %583 = arith.subf %581, %582 : vector<8x128xf32>
    %584 = arith.mulf %554, %544 : vector<8x128xf32>
    %585 = arith.subf %583, %584 : vector<8x128xf32>
    %586 = arith.mulf %585, %568 : vector<8x128xf32>
    %c14_296 = arith.constant 14 : index
    %c0_297 = arith.constant 0 : index
    %c0_298 = arith.constant 0 : index
    %587 = vector.load %arg2[%c14_296, %c0_297, %c0_298] : memref<21x8x128xf32, #tpu.memory_space<vmem>>, vector<1x8x128xf32>
    %588 = vector.shape_cast %587 : vector<1x8x128xf32> to vector<8x128xf32>
    %589 = arith.mulf %528, %519 : vector<8x128xf32>
    %590 = arith.subf %588, %589 : vector<8x128xf32>
    %591 = arith.mulf %559, %544 : vector<8x128xf32>
    %592 = arith.subf %590, %591 : vector<8x128xf32>
    %593 = arith.mulf %592, %568 : vector<8x128xf32>
    %c15_299 = arith.constant 15 : index
    %c0_300 = arith.constant 0 : index
    %c0_301 = arith.constant 0 : index
    %594 = vector.load %arg2[%c15_299, %c0_300, %c0_301] : memref<21x8x128xf32, #tpu.memory_space<vmem>>, vector<1x8x128xf32>
    %595 = vector.shape_cast %594 : vector<1x8x128xf32> to vector<8x128xf32>
    %cst_302 = arith.constant 9.99999974E-6 : f32
    %596 = vector.broadcast %cst_302 : f32 to vector<8x128xf32>
    %597 = arith.addf %595, %596 : vector<8x128xf32>
    %598 = arith.mulf %522, %522 : vector<8x128xf32>
    %599 = arith.subf %597, %598 : vector<8x128xf32>
    %600 = arith.mulf %549, %549 : vector<8x128xf32>
    %601 = arith.subf %599, %600 : vector<8x128xf32>
    %602 = arith.mulf %579, %579 : vector<8x128xf32>
    %603 = arith.subf %601, %602 : vector<8x128xf32>
    %604 = math.rsqrt %603 : vector<8x128xf32>
    %605 = math.log %603 : vector<8x128xf32>
    %cst_303 = arith.constant 5.000000e-01 : f32
    %606 = vector.broadcast %cst_303 : f32 to vector<8x128xf32>
    %607 = arith.mulf %606, %605 : vector<8x128xf32>
    %608 = arith.addf %572, %607 : vector<8x128xf32>
    %c16_304 = arith.constant 16 : index
    %c0_305 = arith.constant 0 : index
    %c0_306 = arith.constant 0 : index
    %609 = vector.load %arg2[%c16_304, %c0_305, %c0_306] : memref<21x8x128xf32, #tpu.memory_space<vmem>>, vector<1x8x128xf32>
    %610 = vector.shape_cast %609 : vector<1x8x128xf32> to vector<8x128xf32>
    %611 = arith.mulf %525, %522 : vector<8x128xf32>
    %612 = arith.subf %610, %611 : vector<8x128xf32>
    %613 = arith.mulf %554, %549 : vector<8x128xf32>
    %614 = arith.subf %612, %613 : vector<8x128xf32>
    %615 = arith.mulf %586, %579 : vector<8x128xf32>
    %616 = arith.subf %614, %615 : vector<8x128xf32>
    %617 = arith.mulf %616, %604 : vector<8x128xf32>
    %c17_307 = arith.constant 17 : index
    %c0_308 = arith.constant 0 : index
    %c0_309 = arith.constant 0 : index
    %618 = vector.load %arg2[%c17_307, %c0_308, %c0_309] : memref<21x8x128xf32, #tpu.memory_space<vmem>>, vector<1x8x128xf32>
    %619 = vector.shape_cast %618 : vector<1x8x128xf32> to vector<8x128xf32>
    %620 = arith.mulf %528, %522 : vector<8x128xf32>
    %621 = arith.subf %619, %620 : vector<8x128xf32>
    %622 = arith.mulf %559, %549 : vector<8x128xf32>
    %623 = arith.subf %621, %622 : vector<8x128xf32>
    %624 = arith.mulf %593, %579 : vector<8x128xf32>
    %625 = arith.subf %623, %624 : vector<8x128xf32>
    %626 = arith.mulf %625, %604 : vector<8x128xf32>
    %c18_310 = arith.constant 18 : index
    %c0_311 = arith.constant 0 : index
    %c0_312 = arith.constant 0 : index
    %627 = vector.load %arg2[%c18_310, %c0_311, %c0_312] : memref<21x8x128xf32, #tpu.memory_space<vmem>>, vector<1x8x128xf32>
    %628 = vector.shape_cast %627 : vector<1x8x128xf32> to vector<8x128xf32>
    %cst_313 = arith.constant 9.99999974E-6 : f32
    %629 = vector.broadcast %cst_313 : f32 to vector<8x128xf32>
    %630 = arith.addf %628, %629 : vector<8x128xf32>
    %631 = arith.mulf %525, %525 : vector<8x128xf32>
    %632 = arith.subf %630, %631 : vector<8x128xf32>
    %633 = arith.mulf %554, %554 : vector<8x128xf32>
    %634 = arith.subf %632, %633 : vector<8x128xf32>
    %635 = arith.mulf %586, %586 : vector<8x128xf32>
    %636 = arith.subf %634, %635 : vector<8x128xf32>
    %637 = arith.mulf %617, %617 : vector<8x128xf32>
    %638 = arith.subf %636, %637 : vector<8x128xf32>
    %639 = math.rsqrt %638 : vector<8x128xf32>
    %640 = math.log %638 : vector<8x128xf32>
    %cst_314 = arith.constant 5.000000e-01 : f32
    %641 = vector.broadcast %cst_314 : f32 to vector<8x128xf32>
    %642 = arith.mulf %641, %640 : vector<8x128xf32>
    %643 = arith.addf %608, %642 : vector<8x128xf32>
    %c19_315 = arith.constant 19 : index
    %c0_316 = arith.constant 0 : index
    %c0_317 = arith.constant 0 : index
    %644 = vector.load %arg2[%c19_315, %c0_316, %c0_317] : memref<21x8x128xf32, #tpu.memory_space<vmem>>, vector<1x8x128xf32>
    %645 = vector.shape_cast %644 : vector<1x8x128xf32> to vector<8x128xf32>
    %646 = arith.mulf %528, %525 : vector<8x128xf32>
    %647 = arith.subf %645, %646 : vector<8x128xf32>
    %648 = arith.mulf %559, %554 : vector<8x128xf32>
    %649 = arith.subf %647, %648 : vector<8x128xf32>
    %650 = arith.mulf %593, %586 : vector<8x128xf32>
    %651 = arith.subf %649, %650 : vector<8x128xf32>
    %652 = arith.mulf %626, %617 : vector<8x128xf32>
    %653 = arith.subf %651, %652 : vector<8x128xf32>
    %654 = arith.mulf %653, %639 : vector<8x128xf32>
    %c20_318 = arith.constant 20 : index
    %c0_319 = arith.constant 0 : index
    %c0_320 = arith.constant 0 : index
    %655 = vector.load %arg2[%c20_318, %c0_319, %c0_320] : memref<21x8x128xf32, #tpu.memory_space<vmem>>, vector<1x8x128xf32>
    %656 = vector.shape_cast %655 : vector<1x8x128xf32> to vector<8x128xf32>
    %cst_321 = arith.constant 9.99999974E-6 : f32
    %657 = vector.broadcast %cst_321 : f32 to vector<8x128xf32>
    %658 = arith.addf %656, %657 : vector<8x128xf32>
    %659 = arith.mulf %528, %528 : vector<8x128xf32>
    %660 = arith.subf %658, %659 : vector<8x128xf32>
    %661 = arith.mulf %559, %559 : vector<8x128xf32>
    %662 = arith.subf %660, %661 : vector<8x128xf32>
    %663 = arith.mulf %593, %593 : vector<8x128xf32>
    %664 = arith.subf %662, %663 : vector<8x128xf32>
    %665 = arith.mulf %626, %626 : vector<8x128xf32>
    %666 = arith.subf %664, %665 : vector<8x128xf32>
    %667 = arith.mulf %654, %654 : vector<8x128xf32>
    %668 = arith.subf %666, %667 : vector<8x128xf32>
    %669 = math.rsqrt %668 : vector<8x128xf32>
    %670 = math.log %668 : vector<8x128xf32>
    %cst_322 = arith.constant 5.000000e-01 : f32
    %671 = vector.broadcast %cst_322 : f32 to vector<8x128xf32>
    %672 = arith.mulf %671, %670 : vector<8x128xf32>
    %673 = arith.addf %643, %672 : vector<8x128xf32>
    %674 = arith.mulf %337, %510 : vector<8x128xf32>
    %675 = arith.mulf %674, %674 : vector<8x128xf32>
    %676 = arith.mulf %516, %674 : vector<8x128xf32>
    %677 = arith.subf %343, %676 : vector<8x128xf32>
    %678 = arith.mulf %677, %535 : vector<8x128xf32>
    %679 = arith.mulf %678, %678 : vector<8x128xf32>
    %680 = arith.addf %675, %679 : vector<8x128xf32>
    %681 = arith.mulf %519, %674 : vector<8x128xf32>
    %682 = arith.subf %346, %681 : vector<8x128xf32>
    %683 = arith.mulf %544, %678 : vector<8x128xf32>
    %684 = arith.subf %682, %683 : vector<8x128xf32>
    %685 = arith.mulf %684, %568 : vector<8x128xf32>
    %686 = arith.mulf %685, %685 : vector<8x128xf32>
    %687 = arith.addf %680, %686 : vector<8x128xf32>
    %688 = arith.mulf %522, %674 : vector<8x128xf32>
    %689 = arith.subf %349, %688 : vector<8x128xf32>
    %690 = arith.mulf %549, %678 : vector<8x128xf32>
    %691 = arith.subf %689, %690 : vector<8x128xf32>
    %692 = arith.mulf %579, %685 : vector<8x128xf32>
    %693 = arith.subf %691, %692 : vector<8x128xf32>
    %694 = arith.mulf %693, %604 : vector<8x128xf32>
    %695 = arith.mulf %694, %694 : vector<8x128xf32>
    %696 = arith.addf %687, %695 : vector<8x128xf32>
    %697 = arith.mulf %525, %674 : vector<8x128xf32>
    %698 = arith.subf %352, %697 : vector<8x128xf32>
    %699 = arith.mulf %554, %678 : vector<8x128xf32>
    %700 = arith.subf %698, %699 : vector<8x128xf32>
    %701 = arith.mulf %586, %685 : vector<8x128xf32>
    %702 = arith.subf %700, %701 : vector<8x128xf32>
    %703 = arith.mulf %617, %694 : vector<8x128xf32>
    %704 = arith.subf %702, %703 : vector<8x128xf32>
    %705 = arith.mulf %704, %639 : vector<8x128xf32>
    %706 = arith.mulf %705, %705 : vector<8x128xf32>
    %707 = arith.addf %696, %706 : vector<8x128xf32>
    %708 = arith.mulf %528, %674 : vector<8x128xf32>
    %709 = arith.subf %355, %708 : vector<8x128xf32>
    %710 = arith.mulf %559, %678 : vector<8x128xf32>
    %711 = arith.subf %709, %710 : vector<8x128xf32>
    %712 = arith.mulf %593, %685 : vector<8x128xf32>
    %713 = arith.subf %711, %712 : vector<8x128xf32>
    %714 = arith.mulf %626, %694 : vector<8x128xf32>
    %715 = arith.subf %713, %714 : vector<8x128xf32>
    %716 = arith.mulf %654, %705 : vector<8x128xf32>
    %717 = arith.subf %715, %716 : vector<8x128xf32>
    %718 = arith.mulf %717, %669 : vector<8x128xf32>
    %719 = arith.mulf %718, %718 : vector<8x128xf32>
    %720 = arith.addf %707, %719 : vector<8x128xf32>
    %721 = arith.mulf %363, %535 : vector<8x128xf32>
    %722 = arith.mulf %721, %721 : vector<8x128xf32>
    %723 = arith.addf %720, %722 : vector<8x128xf32>
    %724 = arith.mulf %544, %721 : vector<8x128xf32>
    %725 = arith.subf %372, %724 : vector<8x128xf32>
    %726 = arith.mulf %725, %568 : vector<8x128xf32>
    %727 = arith.mulf %726, %726 : vector<8x128xf32>
    %728 = arith.addf %723, %727 : vector<8x128xf32>
    %729 = arith.mulf %549, %721 : vector<8x128xf32>
    %730 = arith.subf %377, %729 : vector<8x128xf32>
    %731 = arith.mulf %579, %726 : vector<8x128xf32>
    %732 = arith.subf %730, %731 : vector<8x128xf32>
    %733 = arith.mulf %732, %604 : vector<8x128xf32>
    %734 = arith.mulf %733, %733 : vector<8x128xf32>
    %735 = arith.addf %728, %734 : vector<8x128xf32>
    %736 = arith.mulf %554, %721 : vector<8x128xf32>
    %737 = arith.subf %382, %736 : vector<8x128xf32>
    %738 = arith.mulf %586, %726 : vector<8x128xf32>
    %739 = arith.subf %737, %738 : vector<8x128xf32>
    %740 = arith.mulf %617, %733 : vector<8x128xf32>
    %741 = arith.subf %739, %740 : vector<8x128xf32>
    %742 = arith.mulf %741, %639 : vector<8x128xf32>
    %743 = arith.mulf %742, %742 : vector<8x128xf32>
    %744 = arith.addf %735, %743 : vector<8x128xf32>
    %745 = arith.mulf %559, %721 : vector<8x128xf32>
    %746 = arith.subf %387, %745 : vector<8x128xf32>
    %747 = arith.mulf %593, %726 : vector<8x128xf32>
    %748 = arith.subf %746, %747 : vector<8x128xf32>
    %749 = arith.mulf %626, %733 : vector<8x128xf32>
    %750 = arith.subf %748, %749 : vector<8x128xf32>
    %751 = arith.mulf %654, %742 : vector<8x128xf32>
    %752 = arith.subf %750, %751 : vector<8x128xf32>
    %753 = arith.mulf %752, %669 : vector<8x128xf32>
    %754 = arith.mulf %753, %753 : vector<8x128xf32>
    %755 = arith.addf %744, %754 : vector<8x128xf32>
    %756 = arith.mulf %397, %568 : vector<8x128xf32>
    %757 = arith.mulf %756, %756 : vector<8x128xf32>
    %758 = arith.addf %755, %757 : vector<8x128xf32>
    %759 = arith.mulf %579, %756 : vector<8x128xf32>
    %760 = arith.subf %408, %759 : vector<8x128xf32>
    %761 = arith.mulf %760, %604 : vector<8x128xf32>
    %762 = arith.mulf %761, %761 : vector<8x128xf32>
    %763 = arith.addf %758, %762 : vector<8x128xf32>
    %764 = arith.mulf %586, %756 : vector<8x128xf32>
    %765 = arith.subf %415, %764 : vector<8x128xf32>
    %766 = arith.mulf %617, %761 : vector<8x128xf32>
    %767 = arith.subf %765, %766 : vector<8x128xf32>
    %768 = arith.mulf %767, %639 : vector<8x128xf32>
    %769 = arith.mulf %768, %768 : vector<8x128xf32>
    %770 = arith.addf %763, %769 : vector<8x128xf32>
    %771 = arith.mulf %593, %756 : vector<8x128xf32>
    %772 = arith.subf %422, %771 : vector<8x128xf32>
    %773 = arith.mulf %626, %761 : vector<8x128xf32>
    %774 = arith.subf %772, %773 : vector<8x128xf32>
    %775 = arith.mulf %654, %768 : vector<8x128xf32>
    %776 = arith.subf %774, %775 : vector<8x128xf32>
    %777 = arith.mulf %776, %669 : vector<8x128xf32>
    %778 = arith.mulf %777, %777 : vector<8x128xf32>
    %779 = arith.addf %770, %778 : vector<8x128xf32>
    %780 = arith.mulf %434, %604 : vector<8x128xf32>
    %781 = arith.mulf %780, %780 : vector<8x128xf32>
    %782 = arith.addf %779, %781 : vector<8x128xf32>
    %783 = arith.mulf %617, %780 : vector<8x128xf32>
    %784 = arith.subf %447, %783 : vector<8x128xf32>
    %785 = arith.mulf %784, %639 : vector<8x128xf32>
    %786 = arith.mulf %785, %785 : vector<8x128xf32>
    %787 = arith.addf %782, %786 : vector<8x128xf32>
    %788 = arith.mulf %626, %780 : vector<8x128xf32>
    %789 = arith.subf %456, %788 : vector<8x128xf32>
    %790 = arith.mulf %654, %785 : vector<8x128xf32>
    %791 = arith.subf %789, %790 : vector<8x128xf32>
    %792 = arith.mulf %791, %669 : vector<8x128xf32>
    %793 = arith.mulf %792, %792 : vector<8x128xf32>
    %794 = arith.addf %787, %793 : vector<8x128xf32>
    %795 = arith.mulf %470, %639 : vector<8x128xf32>
    %796 = arith.mulf %795, %795 : vector<8x128xf32>
    %797 = arith.addf %794, %796 : vector<8x128xf32>
    %798 = arith.mulf %654, %795 : vector<8x128xf32>
    %799 = arith.subf %485, %798 : vector<8x128xf32>
    %800 = arith.mulf %799, %669 : vector<8x128xf32>
    %801 = arith.mulf %800, %800 : vector<8x128xf32>
    %802 = arith.addf %797, %801 : vector<8x128xf32>
    %803 = arith.mulf %501, %669 : vector<8x128xf32>
    %804 = arith.mulf %803, %803 : vector<8x128xf32>
    %805 = arith.addf %802, %804 : vector<8x128xf32>
    %cst_323 = arith.constant 6.000000e+00 : f32
    %806 = vector.broadcast %cst_323 : f32 to vector<8x128xf32>
    %807 = arith.subf %805, %806 : vector<8x128xf32>
    %cst_324 = arith.constant 5.000000e-01 : f32
    %808 = vector.broadcast %cst_324 : f32 to vector<8x128xf32>
    %809 = arith.mulf %808, %807 : vector<8x128xf32>
    %810 = arith.subf %673, %505 : vector<8x128xf32>
    %811 = arith.addf %809, %810 : vector<8x128xf32>
    %cst_325 = arith.constant 0.000000e+00 : f32
    %812 = vector.broadcast %cst_325 : f32 to vector<8x128xf32>
    %813 = arith.select %17, %811, %812 : vector<8x128xi1>, vector<8x128xf32>
    %814 = arith.addf %11, %813 : vector<8x128xf32>
    %815 = arith.addf %12, %331 : vector<8x128xf32>
    %c0_326 = arith.constant 0 : index
    %c0_327 = arith.constant 0 : index
    %816 = vector.load %arg4[%c0_326, %c0_327] : memref<16x128xf32, #tpu.memory_space<vmem>>, vector<8x128xf32>
    %817 = arith.addf %816, %814 : vector<8x128xf32>
    %c0_328 = arith.constant 0 : index
    %c0_329 = arith.constant 0 : index
    %818 = vector.load %arg4[%c0_328, %c0_329] : memref<16x128xf32, #tpu.memory_space<vmem>>, vector<8x128xf32>
    tpu.vector_store %arg4[%c0_328, %c0_329], %817 {strides = array<i32>} : memref<16x128xf32, #tpu.memory_space<vmem>>, vector<8x128xf32>,
    %c8_330 = arith.constant 8 : index
    %c0_331 = arith.constant 0 : index
    %819 = vector.load %arg4[%c8_330, %c0_331] : memref<16x128xf32, #tpu.memory_space<vmem>>, vector<8x128xf32>
    %820 = arith.addf %819, %815 : vector<8x128xf32>
    %c8_332 = arith.constant 8 : index
    %c0_333 = arith.constant 0 : index
    %821 = vector.load %arg4[%c8_332, %c0_333] : memref<16x128xf32, #tpu.memory_space<vmem>>, vector<8x128xf32>
    tpu.vector_store %arg4[%c8_332, %c0_333], %820 {strides = array<i32>} : memref<16x128xf32, #tpu.memory_space<vmem>>, vector<8x128xf32>,
    return
  }
  func.func @transform_0(%arg0: i32, %arg1: i32) -> (i32, i32, i32) {
    %c1_i32 = arith.constant 1 : i32
    %0 = arith.muli %arg0, %c1_i32 : i32
    %1 = arith.addi %0, %arg1 : i32
    %c0_i32 = arith.constant 0 : i32
    %c0_i32_0 = arith.constant 0 : i32
    %c0_i32_1 = arith.constant 0 : i32
    return %c0_i32, %1, %c0_i32_0 : i32, i32, i32
  }
  func.func @transform_1(%arg0: i32, %arg1: i32) -> (i32, i32, i32) {
    %c1_i32 = arith.constant 1 : i32
    %0 = arith.muli %arg0, %c1_i32 : i32
    %1 = arith.addi %0, %arg1 : i32
    %c0_i32 = arith.constant 0 : i32
    %c0_i32_0 = arith.constant 0 : i32
    %c0_i32_1 = arith.constant 0 : i32
    return %c0_i32, %1, %c0_i32_0 : i32, i32, i32
  }
  func.func @transform_2(%arg0: i32, %arg1: i32) -> (i32, i32) {
    %c0_i32 = arith.constant 0 : i32
    %c0_i32_0 = arith.constant 0 : i32
    return %arg0, %c0_i32 : i32, i32
  }
}

</mosaic_0001>

<bundles_post_ra>
// kernel: tpu_custom_call.1
= control target key start
LH: loop header
LB: loop body
LE: loop exit
PB: predicated region body
PF: predicated region fallthrough
CT: control target
= control target key end

     0   :  { %7 = vsyncpa [#allocation3], 0  ;;  %s1646_s0 = inlined_call_operand.hbm [shape: f32[21,8,128], index: 0, kind: input, shape index: {}]   ;;  %s1647_s1 = inlined_call_operand.hbm [shape: f32[21,8,128], index: 1, kind: input, shape index: {}]   ;;  %s1648_s2 = inlined_call_operand.hbm [shape: f32[16,128], index: 2, kind: output, shape index: {}]  }
   0x1   :  { %8 = vsyncpa [#allocation6], 0 }
   0x2   :  { %9 = vsyncpa [#allocation4], 0  ;;  %s871_s9 = smov [#allocation2]   ;;  %s799_s13 = scalar_lea.hbm %s1646_s0, 2688 }
   0x3   :  { %s18_s10 = sshll.u32 %s871_s9, 4  ;;  %p800_p0 = scmp.ne.s32.totalorder %s1646_s0, %s799_s13  ;;  %s19_s10 = int_to_ptr.vmem [resolvable:$true] %s18_s10 }
   0x4   :  { %p803_p1 = scmp.lt.u32.totalorder %s799_s13, %s1646_s0 }
   0x6   :  { %p805_p2 = pnand %p803_p1, %p800_p0 }
   0x8   :  { %808 = shalt.err (!%p805_p2)
}
   0x9   :  { %s809_s18 = scalar_lea.vmem %s19_s10, 2688  ;;  %p814_p4 = scmp.lt.s32.totalorder %s19_s10, %s19_s10 }
   0xa   :  { %p810_p3 = scmp.ne.s32.totalorder %s19_s10, %s809_s18  ;;  %p815_p5 = scmp.lt.s32.totalorder %s809_s18, %s809_s18 }
   0xc   :  { %p816_p6 = por %p815_p5, %p814_p4 }
   0xe   :  { %p817_p7 = pnand %p816_p6, %p810_p3 }
  0x10   :  { %820 = shalt.err (!%p817_p7)
}
  0x11   :  { %s872_s19 = smov 128   ;;  %s873_s20 = smov 8  }
  0x12   :  { %24 = dma.hbm_to_vmem [thread:$0]  %s1646_s0, 2688, %s19_s10, [#allocation3], %s872_s19, %s872_s19, %s873_s20  }
  0x13   :  { %s874_s23 = smov [#allocation5]   ;;  %s821_s27 = scalar_lea.hbm %s1647_s1, 2688 }
  0x14   :  { %s33_s24 = sshll.u32 %s874_s23, 4  ;;  %p822_p8 = scmp.ne.s32.totalorder %s1647_s1, %s821_s27  ;;  %s34_s24 = int_to_ptr.vmem [resolvable:$true] %s33_s24 }
  0x15   :  { %p825_p9 = scmp.lt.u32.totalorder %s821_s27, %s1647_s1 }
  0x17   :  { %p827_p10 = pnand %p825_p9, %p822_p8 }
  0x19   :  { %830 = shalt.err (!%p827_p10)
}
  0x1a   :  { %s831_s4 = scalar_lea.vmem %s34_s24, 2688  ;;  %p836_p12 = scmp.lt.s32.totalorder %s34_s24, %s34_s24 }
  0x1b   :  { %p832_p11 = scmp.ne.s32.totalorder %s34_s24, %s831_s4  ;;  %p837_p13 = scmp.lt.s32.totalorder %s831_s4, %s831_s4 }
  0x1d   :  { %p838_p0 = por %p837_p13, %p836_p12 }
  0x1f   :  { %p839_p1 = pnand %p838_p0, %p832_p11 }
  0x21   :  { %842 = shalt.err (!%p839_p1)
}
  0x22   :  { %39 = dma.hbm_to_vmem [thread:$0]  %s1647_s1, 2688, %s34_s24, [#allocation6], %s872_s19, %s872_s19, %s873_s20  }
  0x23   :  { %865 = dma.done.wait [#allocation3], 2688  }
  0x24   :  { %866 = vsyncadd [#allocation3], 4294964608 }
  0x25   :  { %867 = dma.done.wait [#allocation6], 2688  }
  0x26   :  { %868 = vsyncadd [#allocation6], 4294964608  ;;  %v65_v0 = vld [vmem:[#allocation5] sm:$0xff]  ;;  %v921_v1 = vld [vmem:[#allocation2] sm:$0xff]  ;;  %s875_s1 = smov [#allocation7]  }
  0x27   :  { %v923_v2 = vld [vmem:[#allocation5 + $0x8] sm:$0xff]  ;;  %v67_v3 = vsub.f32 %v65_v0, %v921_v1  ;;  %v926_v4 = vld [vmem:[#allocation2 + $0x8] sm:$0xff]  ;;  %v928_v5 = vld [vmem:[#allocation5 + $0x10] sm:$0xff]  ;;  %v942_v14 = vadd.f32 1e-05, %v65_v0  ;;  %s710_s6 = sshll.u32 %s875_s1, 4  ;;  %s711_s6 = int_to_ptr.vmem [resolvable:$true] %s710_s6 }
  0x28   :  { %v930_v6 = vld [vmem:[#allocation2 + $0x10] sm:$0xff]  ;;  %v78_v7 = vsub.f32 %v923_v2, %v926_v4  ;;  %v936_v9 = vld [vmem:[#allocation5 + $0x18] sm:$0xff]  ;;  %v938_v10 = vld [vmem:[#allocation2 + $0x18] sm:$0xff]  ;;  %s843_s7 = scalar_lea.vmem %s711_s6, 256  ;;  %p848_p3 = scmp.lt.s32.totalorder %s711_s6, %s711_s6 }
  0x29   :  { %v90_v8 = vsub.f32 %v928_v5, %v930_v6  ;;  %v68_v11 = vand.u32 2147483647, %v67_v3  ;;  %v70_v12 = vmul.f32 0.5, %v67_v3  ;;  %v102_v13 = vsub.f32 %v936_v9, %v938_v10  ;;  %v962_v31 = vld [vmem:[#allocation5 + $0x20] sm:$0xff]  ;;  %v964_v32 = vld [vmem:[#allocation2 + $0x20] sm:$0xff]  ;;  %v966_v33 = vld [vmem:[#allocation5 + $0x28] sm:$0xff]  ;;  %p844_p2 = scmp.ne.s32.totalorder %s711_s6, %s843_s7  ;;  %p849_p4 = scmp.lt.s32.totalorder %s843_s7, %s843_s7 }
  0x2a   :  { %v79_v15 = vand.u32 2147483647, %v78_v7  ;;  %v81_v16 = vmul.f32 0.5, %v78_v7  ;;  %v114_v37 = vsub.f32 %v962_v31, %v964_v32  ;;  %v972_v38 = vld [vmem:[#allocation2 + $0x28] sm:$0xff]  ;;  %v974_v39 = vld [vmem:[#allocation5 + $0x30] sm:$0xff]  ;;  %v976_v40 = vld [vmem:[#allocation2 + $0x30] sm:$0xff]  ;;  %751 = vrsqrt.f32 %v942_v14 }
  0x2b   :  { %v91_v17 = vand.u32 2147483647, %v90_v8  ;;  %v93_v18 = vmul.f32 0.5, %v90_v8  ;;  %vm944_vm0 = vcmp.lt.f32.partialorder %v68_v11, 1.0  ;;  %v71_v20 = vmul.f32 %v70_v12, %v67_v3  ;;  %v984_v45 = vld [vmem:[#allocation5 + $0x38] sm:$0xff]  ;;  %v986_v46 = vld [vmem:[#allocation2 + $0x38] sm:$0xff]  ;;  %p850_p5 = por %p849_p4, %p848_p3 }
  0x2c   :  { %v723_v21 = vadd.f32 -0.5, %v68_v11  ;;  %v103_v22 = vand.u32 2147483647, %v102_v13  ;;  %vm948_vm1 = vcmp.lt.f32.partialorder %v79_v15, 1.0  ;;  %v82_v24 = vmul.f32 %v81_v16, %v78_v7  ;;  %v1000_v7 = vld [vmem:[#allocation5 + $0x40] sm:$0xff]  ;;  %v1004_v11 = vld [vmem:[#allocation5 + $0x48] sm:$0xff] }
  0x2d   :  { %v724_v25 = vadd.f32 -0.5, %v79_v15  ;;  %vm952_vm2 = vcmp.lt.f32.partialorder %v91_v17, 1.0  ;;  %v94_v28 = vmul.f32 %v93_v18, %v90_v8  ;;  %v725_v29 = vadd.f32 -0.5, %v91_v17  ;;  %v1002_v8 = vld [vmem:[#allocation2 + $0x40] sm:$0xff]  ;;  %v1008_v17 = vld [vmem:[#allocation2 + $0x48] sm:$0xff]  ;;  %v1010_v18 = vld [vmem:[#allocation5 + $0x50] sm:$0xff]  ;;  %p851_p6 = pnand %p850_p5, %p844_p2 }
  0x2e   :  { %v73_v27 = vsel %vm944_vm0, %v71_v20, %v723_v21  ;;  %vm958_vm3 = vcmp.lt.f32.partialorder %v103_v22, 1.0  ;;  %v105_v35 = vmul.f32 0.5, %v102_v13  ;;  %v726_v36 = vadd.f32 -0.5, %v103_v22  ;;  %v1012_v19 = vld [vmem:[#allocation2 + $0x50] sm:$0xff] }
  0x2f   :  { %v84_v34 = vsel %vm948_vm1, %v82_v24, %v724_v25  ;;  %v96_v42 = vsel %vm952_vm2, %v94_v28, %v725_v29  ;;  %v126_v43 = vsub.f32 %v966_v33, %v972_v38  ;;  %v138_v44 = vsub.f32 %v974_v39, %v976_v40  ;;  %v1046_v59 = vld [vmem:[#allocation5 + $0x68] sm:$0xff] }
  0x30   :  { %v85_v41 = vadd.f32 %v84_v34, %v73_v27  ;;  %v106_v47 = vmul.f32 %v105_v35, %v102_v13  ;;  %v115_v48 = vand.u32 2147483647, %v114_v37  ;;  %v117_v49 = vmul.f32 0.5, %v114_v37 }
  0x31   :  { %v150_v50 = vsub.f32 %v984_v45, %v986_v46  ;;  %v127_v52 = vand.u32 2147483647, %v126_v43  ;;  %v129_v53 = vmul.f32 0.5, %v126_v43  ;;  %v139_v54 = vand.u32 2147483647, %v138_v44 }
  0x32   :  { %v97_v51 = vadd.f32 %v96_v42, %v85_v41  ;;  %v108_v55 = vsel %vm958_vm3, %v106_v47, %v726_v36  ;;  %vm116_vm4 = vcmp.lt.f32.partialorder %v115_v48, 1.0  ;;  %v118_v56 = vmul.f32 %v117_v49, %v114_v37 }
  0x33   :  { %v727_v57 = vadd.f32 -0.5, %v115_v48  ;;  %vm992_vm5 = vcmp.lt.f32.partialorder %v127_v52, 1.0  ;;  %v130_v60 = vmul.f32 %v129_v53, %v126_v43  ;;  %v728_v61 = vadd.f32 -0.5, %v127_v52  ;;  %v1036_v52 = vld [vmem:[#allocation2 + $0x58] sm:$0xff]  ;;  %v1038_v53 = vld [vmem:[#allocation5 + $0x60] sm:$0xff] }
  0x34   :  { %v109_v58 = vadd.f32 %v108_v55, %v97_v51  ;;  %vm996_vm6 = vcmp.lt.f32.partialorder %v139_v54, 1.0  ;;  %v141_v0 = vmul.f32 0.5, %v138_v44  ;;  %v729_v3 = vadd.f32 -0.5, %v139_v54  ;;  %v1034_v51 = vld [vmem:[#allocation5 + $0x58] sm:$0xff] }
  0x35   :  { %v120_v62 = vsel %vm116_vm4, %v118_v56, %v727_v57  ;;  %v132_v13 = vsel %vm992_vm5, %v130_v60, %v728_v61  ;;  %v151_v15 = vand.u32 2147483647, %v150_v50  ;;  %v153_v16 = vmul.f32 0.5, %v150_v50  ;;  %v1048_v60 = vld [vmem:[#allocation2 + $0x68] sm:$0xff] }
  0x36   :  { %v121_v12 = vadd.f32 %v120_v62, %v109_v58  ;;  %v142_v20 = vmul.f32 %v141_v0, %v138_v44  ;;  %v162_v21 = vsub.f32 %v1000_v7, %v1002_v8  ;;  %v174_v22 = vsub.f32 %v1004_v11, %v1008_v17  ;;  %v1044_v58 = vld [vmem:[#allocation2 + $0x60] sm:$0xff]  ;;  %v1070_v44 = vld [vmem:[#allocation2 + $0x78] sm:$0xff] }
  0x37   :  { %v186_v23 = vsub.f32 %v1010_v18, %v1012_v19  ;;  %vm152_vm7 = vcmp.lt.f32.partialorder %v151_v15, 1.0  ;;  %v154_v25 = vmul.f32 %v153_v16, %v150_v50  ;;  %v730_v26 = vadd.f32 -0.5, %v151_v15 }
  0x38   :  { %v133_v24 = vadd.f32 %v132_v13, %v121_v12  ;;  %v144_v27 = vsel %vm996_vm6, %v142_v20, %v729_v3  ;;  %v163_v28 = vand.u32 2147483647, %v162_v21  ;;  %v165_v29 = vmul.f32 0.5, %v162_v21  ;;  %v1056_v3 = vld [vmem:[#allocation5 + $0x70] sm:$0xff]  ;;  %v1058_v12 = vld [vmem:[#allocation2 + $0x70] sm:$0xff] }
  0x39   :  { %v175_v30 = vand.u32 2147483647, %v174_v22  ;;  %v156_v35 = vsel %vm152_vm7, %v154_v25, %v730_v26  ;;  %v177_v36 = vmul.f32 0.5, %v174_v22  ;;  %v187_v37 = vand.u32 2147483647, %v186_v23 }
  0x3a   :  { %v145_v34 = vadd.f32 %v144_v27, %v133_v24  ;;  %vm1022_vm8 = vcmp.lt.f32.partialorder %v163_v28, 1.0  ;;  %v166_v42 = vmul.f32 %v165_v29, %v162_v21  ;;  %v731_v43 = vadd.f32 -0.5, %v163_v28 }
  0x3b   :  { %vm1026_vm9 = vcmp.lt.f32.partialorder %v175_v30, 1.0  ;;  %v178_v48 = vmul.f32 %v177_v36, %v174_v22  ;;  %v732_v49 = vadd.f32 -0.5, %v175_v30  ;;  %vm1030_vm10 = vcmp.lt.f32.partialorder %v187_v37, 1.0 }
  0x3c   :  { %v157_v47 = vadd.f32 %v156_v35, %v145_v34  ;;  %v168_v54 = vsel %vm1022_vm8, %v166_v42, %v731_v43  ;;  %v189_v55 = vmul.f32 0.5, %v186_v23  ;;  %v733_v56 = vadd.f32 -0.5, %v187_v37  ;;  %v1068_v43 = vld [vmem:[#allocation5 + $0x78] sm:$0xff] }
  0x3d   :  { %v198_v57 = vsub.f32 %v1034_v51, %v1036_v52  ;;  %v180_v62 = vsel %vm1026_vm9, %v178_v48, %v732_v49  ;;  %v210_v63 = vsub.f32 %v1038_v53, %v1044_v58  ;;  %v222_v0 = vsub.f32 %v1046_v59, %v1048_v60 }
  0x3e   :  { %v169_v61 = vadd.f32 %v168_v54, %v157_v47  ;;  %v190_v13 = vmul.f32 %v189_v55, %v186_v23  ;;  %v234_v20 = vsub.f32 %v1056_v3, %v1058_v12  ;;  %v246_v50 = vsub.f32 %v1068_v43, %v1070_v44  ;;  %v1077_v54 = vld [vmem:[#allocation5 + $0x80] sm:$0xff]  ;;  %v1079_v55 = vld [vmem:[#allocation2 + $0x80] sm:$0xff] }
  0x3f   :  { %v199_v15 = vand.u32 2147483647, %v198_v57  ;;  %v201_v16 = vmul.f32 0.5, %v198_v57  ;;  %v211_v22 = vand.u32 2147483647, %v210_v63  ;;  %v213_v24 = vmul.f32 0.5, %v210_v63 }
  0x40   :  { %v181_v21 = vadd.f32 %v180_v62, %v169_v61  ;;  %v223_v25 = vand.u32 2147483647, %v222_v0  ;;  %v192_v26 = vsel %vm1030_vm10, %v190_v13, %v733_v56  ;;  %v225_v36 = vmul.f32 0.5, %v222_v0 }
  0x41   :  { %vm200_vm11 = vcmp.lt.f32.partialorder %v199_v15, 1.0  ;;  %v202_v27 = vmul.f32 %v201_v16, %v198_v57  ;;  %v734_v28 = vadd.f32 -0.5, %v199_v15  ;;  %vm1064_vm12 = vcmp.lt.f32.partialorder %v211_v22, 1.0  ;;  %v1085_v16 = vld [vmem:[#allocation2 + $0x88] sm:$0xff] }
  0x42   :  { %v193_v29 = vadd.f32 %v192_v26, %v181_v21  ;;  %v214_v23 = vmul.f32 %v213_v24, %v210_v63  ;;  %v735_v34 = vadd.f32 -0.5, %v211_v22  ;;  %v736_v41 = vadd.f32 -0.5, %v223_v25  ;;  %1673 = vst [vmem:[#allocation11_spill] sm:$0xff] %v1085_v16 }
  0x43   :  { %v204_v35 = vsel %vm200_vm11, %v202_v27, %v734_v28  ;;  %v237_v42 = vmul.f32 0.5, %v234_v20  ;;  %v226_v48 = vmul.f32 %v225_v36, %v222_v0  ;;  %v235_v49 = vand.u32 2147483647, %v234_v20  ;;  %v1083_v0 = vld [vmem:[#allocation5 + $0x88] sm:$0xff]  ;;  %v1089_v28 = vpop.eup %751 }
  0x44   :  { %v205_v37 = vadd.f32 %v204_v35, %v193_v29  ;;  %v216_v47 = vsel %vm1064_vm12, %v214_v23, %v735_v34  ;;  %vm224_vm13 = vcmp.lt.f32.partialorder %v223_v25, 1.0  ;;  %v258_v61 = vsub.f32 %v1077_v54, %v1079_v55 }
  0x45   :  { %v238_v57 = vmul.f32 %v237_v42, %v234_v20  ;;  %v228_v62 = vsel %vm224_vm13, %v226_v48, %v736_v41  ;;  %v737_v63 = vadd.f32 -0.5, %v235_v49  ;;  %v247_v13 = vand.u32 2147483647, %v246_v50  ;;  %v1099_v41 = vld [vmem:[#allocation2 + $0x90] sm:$0xff] }
  0x46   :  { %v217_v56 = vadd.f32 %v216_v47, %v205_v37  ;;  %v249_v15 = vmul.f32 0.5, %v246_v50  ;;  %vm236_vm14 = vcmp.lt.f32.partialorder %v235_v49, 1.0  ;;  %v270_v21 = vsub.f32 %v1083_v0, %v1085_v16  ;;  %v1097_v37 = vld [vmem:[#allocation5 + $0x90] sm:$0xff] }
  0x47   :  { %v259_v24 = vand.u32 2147483647, %v258_v61  ;;  %v240_v25 = vsel %vm236_vm14, %v238_v57, %v737_v63  ;;  %v738_v20 = vadd.f32 -0.5, %v247_v13  ;;  %v261_v27 = vmul.f32 0.5, %v258_v61  ;;  %v303_v63 = vld [vmem:[#allocation5 + $0xa0] sm:$0xff] }
  0x48   :  { %v229_v22 = vadd.f32 %v228_v62, %v217_v56  ;;  %v250_v26 = vmul.f32 %v249_v15, %v246_v50  ;;  %vm1091_vm15 = vcmp.lt.f32.partialorder %v247_v13, 1.0  ;;  %v271_v30 = vand.u32 2147483647, %v270_v21  ;;  %v1111_v56 = vld [vmem:[#allocation5 + $0x98] sm:$0xff]  ;;  %v1118_v62 = vld [vmem:[#allocation2 + $0x98] sm:$0xff] }
  0x49   :  { %v262_v35 = vmul.f32 %v261_v27, %v258_v61  ;;  %v739_v36 = vadd.f32 -0.5, %v259_v24  ;;  %vm1101_vm0 = vcmp.lt.f32.partialorder %v259_v24, 1.0  ;;  %v273_v47 = vmul.f32 0.5, %v270_v21  ;;  %1678 = vst [vmem:[#allocation12_spill] sm:$0xff] %v1118_v62  ;;  %v1120_v13 = vld [vmem:[#allocation2 + $0xa0] sm:$0xff] }
  0x4a   :  { %v241_v23 = vadd.f32 %v240_v25, %v229_v22  ;;  %v252_v34 = vsel %vm1091_vm15, %v250_v26, %v738_v20  ;;  %v282_v48 = vsub.f32 %v1097_v37, %v1099_v41  ;;  %v1109_v49 = vmul.f32 %v1089_v28, %v923_v2  ;;  %1679 = vst [vmem:[#allocation13_spill] sm:$0xff] %v1120_v13 }
  0x4b   :  { %v740_v50 = vadd.f32 -0.5, %v271_v30  ;;  %753 = vlog2.f32 %v942_v14  ;;  %v1116_v57 = vmul.f32 %v1089_v28, %v962_v31  ;;  %v1124_v15 = vmul.f32 %v1089_v28, %v966_v33 }
  0x4c   :  { %v253_v61 = vadd.f32 %v252_v34, %v241_v23  ;;  %v325_v2 = vadd.f32 1e-05, %v974_v39  ;;  %v326_v22 = vmul.f32 %v1109_v49, %v1109_v49  ;;  %v264_v24 = vsel %vm1101_vm0, %v262_v35, %v739_v36 }
  0x4d   :  { %1680 = vst [vmem:[#allocation14_spill] sm:$0xff] %v1124_v15  ;;  %v294_v31 = vsub.f32 %v1111_v56, %v1118_v62  ;;  %v1134_v25 = vsub.f32 %v303_v63, %v1120_v13  ;;  %v340_v26 = vmul.f32 %v1116_v57, %v1109_v49  ;;  %v274_v20 = vmul.f32 %v273_v47, %v270_v21 }
  0x4e   :  { %v285_v33 = vmul.f32 0.5, %v282_v48  ;;  %v1138_v27 = vsub.f32 %v325_v2, %v326_v22  ;;  %v343_v39 = vmul.f32 %v1124_v15, %v1109_v49  ;;  %vm1142_vm1 = vcmp.lt.f32.partialorder %v271_v30, 1.0 }
  0x4f   :  { %v283_v23 = vand.u32 2147483647, %v282_v48  ;;  %v1148_v34 = vmul.f32 %v1089_v28, %v928_v5  ;;  %v341_v35 = vsub.f32 %v1004_v11, %v340_v26  ;;  %v1153_v21 = vmul.f32 %v1089_v28, %v936_v9 }
  0x50   :  { %755 = vrsqrt.f32 %v1138_v27  ;;  %v344_v36 = vsub.f32 %v1010_v18, %v343_v39  ;;  %v440_v30 = vadd.f32 1e-05, %v921_v1  ;;  %v265_v42 = vadd.f32 %v264_v24, %v253_v61 }
  0x51   :  { %v295_v47 = vand.u32 2147483647, %v294_v31  ;;  %757 = vlog2.f32 %v1138_v27  ;;  %v367_v5 = vmul.f32 %v1124_v15, %v1148_v34  ;;  %v276_v11 = vsel %vm1142_vm1, %v274_v20, %v740_v50 }
  0x52   :  { %v286_v2 = vmul.f32 %v285_v33, %v282_v48  ;;  %v297_v22 = vmul.f32 0.5, %v294_v31  ;;  %v741_v26 = vadd.f32 -0.5, %v283_v23  ;;  %v334_v18 = vmul.f32 %v1148_v34, %v1109_v49 }
  0x53   :  { %v368_v1 = vsub.f32 %v1056_v3, %v367_v5  ;;  %v392_v61 = vmul.f32 %v1124_v15, %v1153_v21  ;;  %vm1169_vm2 = vcmp.lt.f32.partialorder %v283_v23, 1.0  ;;  %v337_v50 = vmul.f32 %v1153_v21, %v1109_v49 }
  0x54   :  { %v1177_v48 = vmul.f32 %v1124_v15, %v1116_v57  ;;  %v1179_v20 = vadd.f32 1e-05, %v303_v63  ;;  %v277_v39 = vadd.f32 %v276_v11, %v265_v42  ;;  %v346_v3 = vadd.f32 1e-05, %v1034_v51 }
  0x55   :  { %v754_v33 = vpop.eup %753  ;;  %v393_v29 = vsub.f32 %v1083_v0, %v392_v61  ;;  %v424_v23 = vmul.f32 %v1124_v15, %v1124_v15  ;;  %v347_v5 = vmul.f32 %v1148_v34, %v1148_v34  ;;  %v362_v9 = vmul.f32 %v1116_v57, %v1148_v34 }
  0x56   :  { %v415_v62 = vsub.f32 %v1111_v56, %v1177_v48  ;;  %759 = vrsqrt.f32 %v440_v30  ;;  %v288_v63 = vsel %vm1169_vm2, %v286_v2, %v741_v26  ;;  %v335_v51 = vsub.f32 %v984_v45, %v334_v18 }
  0x57   :  { %v385_v0 = vmul.f32 %v1116_v57, %v1153_v21  ;;  %v425_v42 = vsub.f32 %v1179_v20, %v424_v23  ;;  %vm1197_vm3 = vcmp.lt.f32.partialorder %v295_v47, 1.0  ;;  %v318_v61 = vmul.f32 0.6931472, %v754_v33 }
  0x58   :  { %v338_v13 = vsub.f32 %v1000_v7, %v337_v50  ;;  %v298_v16 = vmul.f32 %v297_v22, %v294_v31  ;;  %v742_v56 = vadd.f32 -0.5, %v295_v47  ;;  %v309_v48 = vmul.f32 0.5, %v1134_v25 }
  0x59   :  { %v1687_v2 = vand.u32 2147483647, %v1134_v25  ;;  %v289_v18 = vadd.f32 %v288_v63, %v277_v39  ;;  %v348_v24 = vsub.f32 %v346_v3, %v347_v5  ;;  %v363_v20 = vsub.f32 %v1046_v59, %v362_v9 }
  0x5a   :  { %v1205_v45 = vpop.eup %755  ;;  %v399_v23 = vadd.f32 1e-05, %v1097_v37  ;;  %v386_v31 = vsub.f32 %v1077_v54, %v385_v0  ;;  %v400_v47 = vmul.f32 %v1116_v57, %v1116_v57  ;;  %v319_v22 = vmul.f32 0.5, %v318_v61 }
  0x5b   :  { %v743_v26 = vadd.f32 -0.5, %v1687_v2  ;;  %v758_v15 = vpop.eup %757  ;;  %v1210_v33 = vmul.f32 %v1205_v45, %v335_v51  ;;  %v1213_v7 = vmul.f32 %v1205_v45, %v341_v35  ;;  %v1219_v39 = vmul.f32 %v1205_v45, %v338_v13 }
  0x5c   :  { %v331_v50 = vmul.f32 0.6931472, %v758_v15  ;;  %v1222_v59 = vmul.f32 %v1205_v45, %v344_v36  ;;  %v300_v37 = vsel %vm1197_vm3, %v298_v16, %v742_v56  ;;  %v357_v54 = vmul.f32 %v1153_v21, %v1148_v34 }
  0x5d   :  { %v349_v35 = vmul.f32 %v1210_v33, %v1210_v33  ;;  %v364_v9 = vmul.f32 %v1213_v7, %v1210_v33  ;;  %v387_v15 = vmul.f32 %v1213_v7, %v1219_v39  ;;  %v401_v63 = vsub.f32 %v399_v23, %v400_v47 }
  0x5e   :  { %v332_v3 = vmul.f32 0.5, %v331_v50  ;;  %v369_v13 = vmul.f32 %v1222_v59, %v1210_v33  ;;  %v394_v36 = vmul.f32 %v1222_v59, %v1219_v39  ;;  %761 = vlog2.f32 %v440_v30 }
  0x5f   :  { %v1238_v16 = vsub.f32 %v348_v24, %v349_v35  ;;  %v365_v5 = vsub.f32 %v363_v20, %v364_v9  ;;  %v1242_v61 = vsub.f32 %v386_v31, %v387_v15  ;;  %v402_v2 = vmul.f32 %v1213_v7, %v1213_v7 }
  0x60   :  { %v760_v51 = vpop.eup %759  ;;  %v1240_v0 = vadd.f32 %v332_v3, %v319_v22  ;;  %v370_v11 = vsub.f32 %v368_v1, %v369_v13  ;;  %v1244_v56 = vsub.f32 %v393_v29, %v394_v36  ;;  %v416_v24 = vmul.f32 %v1222_v59, %v1213_v7 }
  0x61   :  { %763 = vrsqrt.f32 %v1238_v16  ;;  %v426_v20 = vmul.f32 %v1222_v59, %v1222_v59  ;;  %v310_v30 = vmul.f32 %v309_v48, %v1134_v25  ;;  %v372_v23 = vadd.f32 1e-05, %v1068_v43 }
  0x62   :  { %v445_v1 = vmul.f32 %v760_v51, %v926_v4  ;;  %v450_v29 = vadd.f32 1e-05, %v976_v40  ;;  %v373_v31 = vmul.f32 %v1153_v21, %v1153_v21  ;;  %v1259_v47 = vsub.f32 %v401_v63, %v402_v2 }
  0x63   :  { %v1261_v22 = vsub.f32 %v415_v62, %v416_v24  ;;  %v1263_v50 = vsub.f32 %v425_v42, %v426_v20  ;;  %v1688_v35 = vand.u32 2147483647, %v1134_v25  ;;  %v358_v48 = vsub.f32 %v1038_v53, %v357_v54 }
  0x64   :  { %v359_v43 = vmul.f32 %v1219_v39, %v1210_v33  ;;  %v451_v4 = vmul.f32 %v445_v1, %v445_v1  ;;  %v301_v9 = vadd.f32 %v300_v37, %v289_v18  ;;  %v374_v13 = vsub.f32 %v372_v23, %v373_v31 }
  0x65   :  { %vm308_vm4 = vcmp.lt.f32.partialorder %v1688_v35, 1.0  ;;  %v375_v15 = vmul.f32 %v1219_v39, %v1219_v39  ;;  %v1273_v62 = vmul.f32 %v760_v51, %v930_v6  ;;  %v1276_v36 = vmul.f32 %v760_v51, %v938_v10 }
  0x66   :  { %v452_v40 = vsub.f32 %v450_v29, %v451_v4  ;;  %v312_v3 = vsel %vm308_vm4, %v310_v30, %v743_v26  ;;  %v360_v42 = vsub.f32 %v358_v48, %v359_v43  ;;  %v316_v18 = vmul.f32 %v1089_v28, %v942_v14 }
  0x67   :  { %v1278_v53 = vadd.f32 %v312_v3, %v301_v9  ;;  %v376_v37 = vsub.f32 %v374_v13, %v375_v15  ;;  %v458_v6 = vmul.f32 %v1273_v62, %v445_v1  ;;  %v470_v54 = vadd.f32 1e-05, %v1036_v52 }
  0x68   :  { %765 = vrsqrt.f32 %v452_v40  ;;  %v762_v25 = vpop.eup %761  ;;  %v1297_v14 = vmul.f32 %v760_v51, %v964_v32  ;;  %v1300_v28 = vmul.f32 %v760_v51, %v972_v38  ;;  %v461_v20 = vmul.f32 %v1276_v36, %v445_v1 }
  0x69   :  { %767 = vlog2.f32 %v452_v40  ;;  %v443_v24 = vmul.f32 0.6931472, %v762_v25  ;;  %v471_v52 = vmul.f32 %v1273_v62, %v1273_v62  ;;  %v459_v29 = vsub.f32 %v986_v46, %v458_v6  ;;  %704 = vst [vmem:[#allocation7 + $0x8] sm:$0xff] %v1278_v53 }
  0x6a   :  { %769 = vlog2.f32 %v1238_v16  ;;  %v1328_v31 = vmul.f32 %v760_v51, %v316_v18  ;;  %v464_v46 = vmul.f32 %v1297_v14, %v445_v1  ;;  %v480_v51 = vmul.f32 %v1276_v36, %v1273_v62 }
  0x6b   :  { %v1282_v26 = vpop.eup %763  ;;  %v1352_v13 = vmul.f32 %v1297_v14, %v1273_v62  ;;  %v472_v25 = vsub.f32 %v470_v54, %v471_v52  ;;  %v1358_v18 = vadd.f32 1e-05, %v1070_v44  ;;  %v329_v6 = vmul.f32 %v1205_v45, %v1138_v27 }
  0x6c   :  { %v1288_v63 = vmul.f32 %v1282_v26, %v360_v42  ;;  %v1291_v10 = vmul.f32 %v1282_v26, %v365_v5  ;;  %v1294_v2 = vmul.f32 %v1282_v26, %v370_v11  ;;  %v481_v54 = vsub.f32 %v1044_v58, %v480_v51 }
  0x6d   :  { %v1372_v44 = vmul.f32 %v1300_v28, %v1273_v62  ;;  %v1384_v58 = vmul.f32 %v1297_v14, %v1276_v36 }
  0x6e   :  { %v377_v30 = vmul.f32 %v1288_v63, %v1288_v63  ;;  %v1309_v5 = vmul.f32 %v1291_v10, %v1288_v63  ;;  %v1313_v11 = vmul.f32 %v1294_v2, %v1288_v63  ;;  %v1317_v32 = vmul.f32 %v1291_v10, %v1291_v10 }
  0x6f   :  { %v1321_v38 = vmul.f32 %v1294_v2, %v1291_v10  ;;  %v1325_v23 = vmul.f32 %v1294_v2, %v1294_v2 }
  0x70   :  { %v1330_v35 = vsub.f32 %v376_v37, %v377_v30  ;;  %v390_v48 = vsub.f32 %v1242_v61, %v1309_v5  ;;  %v397_v43 = vsub.f32 %v1244_v56, %v1313_v11  ;;  %v405_v4 = vsub.f32 %v1259_v47, %v1317_v32 }
  0x71   :  { %v419_v9 = vsub.f32 %v1261_v22, %v1321_v38  ;;  %v429_v40 = vsub.f32 %v1263_v50, %v1325_v23  ;;  %v462_v61 = vsub.f32 %v1002_v8, %v461_v20  ;;  %v467_v56 = vmul.f32 %v1300_v28, %v445_v1 }
  0x72   :  { %v1345_v3 = vpop.eup %765  ;;  %771 = vrsqrt.f32 %v1330_v35  ;;  %v562_v37 = vmul.f32 %v1328_v31, %v445_v1  ;;  %v444_v8 = vmul.f32 0.5, %v443_v24  ;;  %v1364_v30 = vadd.f32 1e-05, %v1099_v41 }
  0x73   :  { %v768_v15 = vpop.eup %767  ;;  %v1355_v42 = vmul.f32 %v1345_v3, %v459_v29  ;;  %v465_v11 = vsub.f32 %v1008_v17, %v464_v46  ;;  %v1375_v27 = vmul.f32 %v1345_v3, %v462_v61  ;;  %v468_v45 = vsub.f32 %v1012_v19, %v467_v56 }
  0x74   :  { %v455_v20 = vmul.f32 0.6931472, %v768_v15  ;;  %v770_v5 = vpop.eup %769  ;;  %v486_v41 = vsub.f32 %v1048_v60, %v1352_v13  ;;  %v496_v17 = vmul.f32 %v1276_v36, %v1276_v36  ;;  %v563_v52 = vsub.f32 %v1109_v49, %v562_v37 }
  0x75   :  { %v473_v29 = vmul.f32 %v1355_v42, %v1355_v42  ;;  %773 = vlog2.f32 %v1330_v35  ;;  %v1392_v19 = vmul.f32 %v1300_v28, %v1276_v36  ;;  %v1396_v60 = vmul.f32 %v1297_v14, %v1297_v14 }
  0x76   :  { %v456_v1 = vmul.f32 0.5, %v455_v20  ;;  %v1399_v51 = vmul.f32 %v1345_v3, %v465_v11  ;;  %v491_v61 = vsub.f32 %v1058_v12, %v1372_v44  ;;  %v567_v49 = vmul.f32 %v1328_v31, %v1273_v62 }
  0x77   :  { %v474_v24 = vsub.f32 %v472_v25, %v473_v29  ;;  %v1406_v56 = vmul.f32 %v1345_v3, %v468_v45  ;;  %v482_v13 = vmul.f32 %v1375_v27, %v1355_v42  ;;  %v583_v15 = vmul.f32 %v1328_v31, %v1297_v14 }
  0x78   :  { %v1388_v46 = vadd.f32 %v456_v1, %v444_v8  ;;  %v1414_v25 = vmul.f32 %v1282_v26, %v1238_v16  ;;  %v497_v37 = vsub.f32 %v1358_v18, %v496_v17  ;;  %v508_v12 = vsub.f32 %v1079_v55, %v1384_v58 }
  0x79   :  { %775 = vrsqrt.f32 %v474_v24  ;;  %v1420_v62 = vmul.f32 %v1345_v3, %v563_v52  ;;  %v354_v20 = vmul.f32 0.6931472, %v770_v5  ;;  %v1426_v11 = vmul.f32 %v1328_v31, %v1276_v36 }
  0x7a   :  { %777 = vlog2.f32 %v474_v24  ;;  %v584_v29 = vsub.f32 %v1116_v57, %v583_v15  ;;  %v594_v16 = vmul.f32 %v1328_v31, %v1300_v28  ;;  %v568_v18 = vsub.f32 %v1148_v34, %v567_v49  ;;  %v1689_v24 = vld [vmem:[#allocation14_spill] sm:$0xff] }
  0x7b   :  { %v585_v5 = vmul.f32 %v1420_v62, %v1399_v51  ;;  %v483_v44 = vsub.f32 %v481_v54, %v482_v13  ;;  %v487_v36 = vmul.f32 %v1399_v51, %v1355_v42  ;;  %v492_v57 = vmul.f32 %v1406_v56, %v1355_v42 }
  0x7c   :  { %v1422_v8 = vpop.eup %771  ;;  %v498_v1 = vmul.f32 %v1375_v27, %v1375_v27  ;;  %v569_v54 = vmul.f32 %v1420_v62, %v1355_v42  ;;  %v595_v17 = vsub.f32 %v1689_v24, %v594_v16  ;;  %v596_v58 = vmul.f32 %v1420_v62, %v1406_v56 }
  0x7d   :  { %v1432_v26 = vmul.f32 %v1422_v8, %v390_v48  ;;  %v1435_v55 = vmul.f32 %v1422_v8, %v397_v43  ;;  %v1452_v45 = vsub.f32 %v584_v29, %v585_v5  ;;  %v1460_v52 = vmul.f32 %v1345_v3, %v329_v6  ;;  %v1690_v5 = vld [vmem:[#allocation11_spill] sm:$0xff] }
  0x7e   :  { %v355_v16 = vmul.f32 0.5, %v354_v20  ;;  %v515_v3 = vsub.f32 %v1690_v5, %v1392_v19  ;;  %v523_v6 = vsub.f32 %v1364_v30, %v1396_v60  ;;  %v1479_v47 = vsub.f32 %v595_v17, %v596_v58 }
  0x7f   :  { %v406_v48 = vmul.f32 %v1432_v26, %v1432_v26  ;;  %v420_v43 = vmul.f32 %v1435_v55, %v1432_v26  ;;  %v430_v34 = vmul.f32 %v1435_v55, %v1435_v55  ;;  %v774_v29 = vpop.eup %773  ;;  %v488_v22 = vsub.f32 %v486_v41, %v487_v36 }
  0x80   :  { %v499_v38 = vsub.f32 %v497_v37, %v498_v1  ;;  %v610_v50 = vmul.f32 %v1460_v52, %v1355_v42  ;;  %v509_v30 = vmul.f32 %v1399_v51, %v1375_v27  ;;  %v516_v60 = vmul.f32 %v1406_v56, %v1375_v27 }
  0x81   :  { %v1465_v49 = vsub.f32 %v405_v4, %v406_v48  ;;  %v421_v13 = vsub.f32 %v419_v9, %v420_v43  ;;  %v1473_v15 = vsub.f32 %v429_v40, %v430_v34  ;;  %v493_v9 = vsub.f32 %v491_v61, %v492_v57 }
  0x82   :  { %v570_v40 = vsub.f32 %v568_v18, %v569_v54  ;;  %v575_v41 = vsub.f32 %v1153_v21, %v1426_v11  ;;  %v382_v37 = vmul.f32 0.6931472, %v774_v29  ;;  %v576_v53 = vmul.f32 %v1420_v62, %v1375_v27 }
  0x83   :  { %v776_v32 = vpop.eup %775  ;;  %779 = vrsqrt.f32 %v1465_v49  ;;  %v615_v20 = vmul.f32 %v1460_v52, %v1375_v27  ;;  %v611_v18 = vsub.f32 %v1210_v33, %v610_v50  ;;  %v631_v36 = vmul.f32 %v1460_v52, %v1406_v56 }
  0x84   :  { %v778_v23 = vpop.eup %777  ;;  %781 = vlog2.f32 %v1465_v49  ;;  %v484_v4 = vmul.f32 %v776_v32, %v483_v44  ;;  %v622_v44 = vmul.f32 %v1460_v52, %v1399_v51  ;;  %v1501_v57 = vmul.f32 %v776_v32, %v488_v22 }
  0x85   :  { %v477_v19 = vmul.f32 0.6931472, %v778_v23  ;;  %v1503_v21 = vmul.f32 %v776_v32, %v493_v9  ;;  %v1507_v1 = vmul.f32 %v776_v32, %v570_v40  ;;  %v356_v48 = vadd.f32 %v355_v16, %v1240_v0 }
  0x86   :  { %v500_v42 = vmul.f32 %v484_v4, %v484_v4  ;;  %v510_v33 = vsub.f32 %v508_v12, %v509_v30  ;;  %v517_v43 = vsub.f32 %v515_v3, %v516_v60  ;;  %v524_v34 = vmul.f32 %v1399_v51, %v1399_v51 }
  0x87   :  { %v478_v61 = vmul.f32 0.5, %v477_v19  ;;  %v587_v54 = vmul.f32 %v1507_v1, %v1501_v57  ;;  %v598_v24 = vmul.f32 %v1507_v1, %v1503_v21  ;;  %v383_v17 = vmul.f32 0.5, %v382_v37 }
  0x88   :  { %v1505_v11 = vsub.f32 %v499_v38, %v500_v42  ;;  %v1520_v58 = vmul.f32 %v776_v32, %v611_v18  ;;  %v623_v0 = vsub.f32 %v1213_v7, %v622_v44  ;;  %v577_v12 = vsub.f32 %v575_v41, %v576_v53 }
  0x89   :  { %v1511_v27 = vadd.f32 %v478_v61, %v1388_v46  ;;  %v632_v46 = vsub.f32 %v1222_v59, %v631_v36  ;;  %v588_v29 = vsub.f32 %v1452_v45, %v587_v54  ;;  %v599_v16 = vsub.f32 %v1479_v47, %v598_v24  ;;  %v1691_v36 = vld [vmem:[#allocation13_spill] sm:$0xff] }
  0x8a   :  { %783 = vrsqrt.f32 %v1505_v11  ;;  %v616_v5 = vsub.f32 %v1219_v39, %v615_v20  ;;  %v511_v22 = vmul.f32 %v1501_v57, %v484_v4  ;;  %v578_v38 = vmul.f32 %v1507_v1, %v484_v4 }
  0x8b   :  { %v624_v50 = vmul.f32 %v1520_v58, %v1501_v57  ;;  %v633_v7 = vmul.f32 %v1520_v58, %v1503_v21  ;;  %v518_v45 = vmul.f32 %v1503_v21, %v484_v4  ;;  %v617_v39 = vmul.f32 %v1520_v58, %v484_v4 }
  0x8c   :  { %v1541_v47 = vmul.f32 %v776_v32, %v1414_v25  ;;  %v384_v9 = vadd.f32 %v383_v17, %v356_v48  ;;  %v525_v41 = vsub.f32 %v523_v6, %v524_v34  ;;  %v512_v42 = vsub.f32 %v510_v33, %v511_v22  ;;  %v1692_v34 = vld [vmem:[#allocation12_spill] sm:$0xff] }
  0x8d   :  { %v1527_v3 = vpop.eup %779  ;;  %v1543_v19 = vsub.f32 %v623_v0, %v624_v50  ;;  %v1545_v30 = vsub.f32 %v632_v46, %v633_v7  ;;  %v526_v53 = vmul.f32 %v1501_v57, %v1501_v57  ;;  %v579_v25 = vsub.f32 %v577_v12, %v578_v38 }
  0x8e   :  { %v782_v59 = vpop.eup %781  ;;  %v1536_v23 = vmul.f32 %v1527_v3, %v421_v13  ;;  %v535_v13 = vmul.f32 %v1300_v28, %v1297_v14  ;;  %v519_v20 = vsub.f32 %v517_v43, %v518_v45  ;;  %v618_v61 = vsub.f32 %v616_v5, %v617_v39 }
  0x8f   :  { %v411_v40 = vmul.f32 0.6931472, %v782_v59  ;;  %v645_v18 = vmul.f32 %v1541_v47, %v484_v4  ;;  %v544_v48 = vadd.f32 1e-05, %v1691_v36  ;;  %v545_v6 = vmul.f32 %v1300_v28, %v1300_v28 }
  0x90   :  { %v432_v60 = vmul.f32 %v1536_v23, %v1536_v23  ;;  %v536_v33 = vsub.f32 %v1692_v34, %v535_v13  ;;  %v537_v54 = vmul.f32 %v1406_v56, %v1399_v51  ;;  %v527_v24 = vsub.f32 %v525_v41, %v526_v53 }
  0x91   :  { %v412_v37 = vmul.f32 0.5, %v411_v40  ;;  %v646_v4 = vsub.f32 %v1288_v63, %v645_v18  ;;  %v380_v46 = vmul.f32 %v1422_v8, %v1330_v35  ;;  %v546_v12 = vsub.f32 %v544_v48, %v545_v6 }
  0x92   :  { %v1554_v32 = vsub.f32 %v1473_v15, %v432_v60  ;;  %v561_v5 = vmul.f32 %v1328_v31, %v1328_v31  ;;  %v538_v22 = vsub.f32 %v536_v33, %v537_v54  ;;  %v547_v51 = vmul.f32 %v1406_v56, %v1406_v56 }
  0x93   :  { %v413_v44 = vadd.f32 %v412_v37, %v384_v9  ;;  %v539_v59 = vmul.f32 %v1503_v21, %v1501_v57  ;;  %v565_v63 = vmul.f32 %v1420_v62, %v1420_v62  ;;  %v650_v35 = vmul.f32 %v1541_v47, %v1501_v57 }
  0x94   :  { %v784_v14 = vpop.eup %783  ;;  %785 = vlog2.f32 %v1554_v32  ;;  %v548_v40 = vsub.f32 %v546_v12, %v547_v51  ;;  %v549_v62 = vmul.f32 %v1503_v21, %v1503_v21  ;;  %v572_v57 = vmul.f32 %v1507_v1, %v1507_v1 }
  0x95   :  { %v513_v15 = vmul.f32 %v784_v14, %v512_v42  ;;  %v580_v43 = vmul.f32 %v784_v14, %v579_v25  ;;  %v520_v17 = vmul.f32 %v784_v14, %v519_v20  ;;  %v1564_v0 = vmul.f32 %v784_v14, %v618_v61 }
  0x96   :  { %v1582_v39 = vmul.f32 %v784_v14, %v646_v4  ;;  %v1585_v9 = vmul.f32 %v784_v14, %v380_v46  ;;  %v566_v41 = vadd.f32 %v565_v63, %v561_v5  ;;  %v651_v37 = vsub.f32 %v1291_v10, %v650_v35 }
  0x97   :  { %v528_v28 = vmul.f32 %v513_v15, %v513_v15  ;;  %v589_v38 = vmul.f32 %v580_v43, %v513_v15  ;;  %v600_v50 = vmul.f32 %v580_v43, %v520_v17  ;;  %v626_v31 = vmul.f32 %v1564_v0, %v513_v15 }
  0x98   :  { %v635_v56 = vmul.f32 %v1564_v0, %v520_v17  ;;  %v541_v13 = vmul.f32 %v520_v17, %v513_v15  ;;  %v652_v42 = vmul.f32 %v1582_v39, %v513_v15  ;;  %v669_v25 = vmul.f32 %v1585_v9, %v513_v15 }
  0x99   :  { %v529_v7 = vsub.f32 %v527_v24, %v528_v28  ;;  %v590_v8 = vsub.f32 %v588_v29, %v589_v38  ;;  %v1579_v45 = vsub.f32 %v599_v16, %v600_v50  ;;  %v627_v60 = vsub.f32 %v1543_v19, %v626_v31 }
  0x9a   :  { %v636_v29 = vsub.f32 %v1545_v30, %v635_v56  ;;  %v540_v16 = vsub.f32 %v538_v22, %v539_v59  ;;  %v657_v19 = vmul.f32 %v1541_v47, %v1503_v21  ;;  %v550_v61 = vsub.f32 %v548_v40, %v549_v62 }
  0x9b   :  { %787 = vrsqrt.f32 %v529_v7  ;;  %v551_v18 = vmul.f32 %v520_v17, %v520_v17  ;;  %v573_v1 = vadd.f32 %v572_v57, %v566_v41  ;;  %v581_v36 = vmul.f32 %v580_v43, %v580_v43 }
  0x9c   :  { %789 = vlog2.f32 %v1505_v11  ;;  %v542_v48 = vsub.f32 %v540_v16, %v541_v13  ;;  %v653_v6 = vsub.f32 %v651_v37, %v652_v42  ;;  %v658_v10 = vsub.f32 %v1294_v2, %v657_v19 }
  0x9d   :  { %791 = vlog2.f32 %v529_v7  ;;  %v659_v14 = vmul.f32 %v1582_v39, %v520_v17  ;;  %v670_v11 = vsub.f32 %v1432_v26, %v669_v25  ;;  %v409_v21 = vmul.f32 %v1527_v3, %v1465_v49 }
  0x9e   :  { %v786_v53 = vpop.eup %785  ;;  %v552_v54 = vsub.f32 %v550_v61, %v551_v18  ;;  %v582_v15 = vadd.f32 %v581_v36, %v573_v1  ;;  %v674_v24 = vmul.f32 %v1585_v9, %v520_v17 }
  0x9f   :  { %v437_v20 = vmul.f32 0.6931472, %v786_v53  ;;  %v660_v12 = vsub.f32 %v658_v10, %v659_v14  ;;  %v608_v53 = vmul.f32 %v1460_v52, %v1460_v52  ;;  %v643_v10 = vmul.f32 %v1541_v47, %v1541_v47 }
  0xa0   :  { %v54_v47 = vlaneseq }
  0xa1   :  { %v438_v30 = vmul.f32 0.5, %v437_v20  ;;  %v613_v20 = vmul.f32 %v1520_v58, %v1520_v58  ;;  %v648_v58 = vmul.f32 %v1582_v39, %v1582_v39 }
  0xa3   :  { %v1604_v34 = vadd.f32 %v438_v30, %v413_v44  ;;  %v675_v44 = vsub.f32 %v1435_v55, %v674_v24  ;;  %v667_v24 = vmul.f32 %v1585_v9, %v1585_v9  ;;  %v57_v9 = vand.u32 127, %v54_v47 }
  0xa5   :  { %v788_v33 = vpop.eup %787 }
  0xa6   :  { %v543_v43 = vmul.f32 %v788_v33, %v542_v48  ;;  %v591_v4 = vmul.f32 %v788_v33, %v590_v8  ;;  %v628_v46 = vmul.f32 %v788_v33, %v627_v60  ;;  %v654_v28 = vmul.f32 %v788_v33, %v653_v6  ;;  %v790_v38 = vpop.eup %789 }
  0xa7   :  { %v671_v2 = vmul.f32 %v788_v33, %v670_v11  ;;  %v1607_v26 = vmul.f32 %v788_v33, %v409_v21  ;;  %v504_v8 = vmul.f32 0.6931472, %v790_v38  ;;  %v792_v56 = vpop.eup %791 }
  0xa8   :  { %v553_v5 = vmul.f32 %v543_v43, %v543_v43  ;;  %v592_v22 = vmul.f32 %v591_v4, %v591_v4  ;;  %v602_v51 = vmul.f32 %v591_v4, %v543_v43  ;;  %v637_v49 = vmul.f32 %v628_v46, %v543_v43 }
  0xa9   :  { %v661_v3 = vmul.f32 %v654_v28, %v543_v43  ;;  %v676_v35 = vmul.f32 %v671_v2, %v543_v43  ;;  %v684_v31 = vmul.f32 %v1607_v26, %v543_v43  ;;  %v505_v62 = vmul.f32 0.5, %v504_v8 }
  0xaa   :  { %v554_v50 = vsub.f32 %v552_v54, %v553_v5  ;;  %v593_v7 = vadd.f32 %v592_v22, %v582_v15  ;;  %v603_v17 = vsub.f32 %v1579_v45, %v602_v51  ;;  %v638_v59 = vsub.f32 %v636_v29, %v637_v49 }
  0xab   :  { %v662_v63 = vsub.f32 %v660_v12, %v661_v3  ;;  %v677_v40 = vsub.f32 %v675_v44, %v676_v35  ;;  %v685_v60 = vsub.f32 %v1536_v23, %v684_v31  ;;  %v532_v41 = vmul.f32 0.6931472, %v792_v56 }
  0xac   :  { %793 = vrsqrt.f32 %v554_v50  ;;  %v506_v55 = vadd.f32 %v505_v62, %v1511_v27  ;;  %v620_v27 = vmul.f32 %v1564_v0, %v1564_v0  ;;  %v629_v30 = vmul.f32 %v628_v46, %v628_v46 }
  0xad   :  { %795 = vlog2.f32 %v554_v50  ;;  %v533_v57 = vmul.f32 0.5, %v532_v41  ;;  %v655_v0 = vmul.f32 %v654_v28, %v654_v28  ;;  %v672_v12 = vmul.f32 %v671_v2, %v671_v2 }
  0xae   :  { %797 = vrsqrt.f32 %v1554_v32  ;;  %v682_v28 = vmul.f32 %v1607_v26, %v1607_v26  ;;  %v55_v49 = vshrl.u32 %v54_v47, 7 }
  0xaf   :  { %v534_v29 = vadd.f32 %v533_v57, %v506_v55 }
  0xb6   :  { %v794_v16 = vpop.eup %793 }
  0xb7   :  { %v796_v13 = vpop.eup %795  ;;  %v604_v45 = vmul.f32 %v794_v16, %v603_v17  ;;  %v639_v18 = vmul.f32 %v794_v16, %v638_v59  ;;  %v663_v11 = vmul.f32 %v794_v16, %v662_v63  ;;  %v678_v43 = vmul.f32 %v794_v16, %v677_v40 }
  0xb8   :  { %v557_v37 = vmul.f32 0.6931472, %v796_v13  ;;  %v686_v51 = vmul.f32 %v794_v16, %v685_v60  ;;  %v58_v17 = vmul.u32 128, %v55_v49 }
  0xb9   :  { %v605_v42 = vmul.f32 %v604_v45, %v604_v45  ;;  %v640_v6 = vmul.f32 %v639_v18, %v639_v18  ;;  %v664_v54 = vmul.f32 %v663_v11, %v663_v11  ;;  %v679_v22 = vmul.f32 %v678_v43, %v678_v43 }
  0xba   :  { %v558_v19 = vmul.f32 0.5, %v557_v37  ;;  %v687_v44 = vmul.f32 %v686_v51, %v686_v51  ;;  %v59_v63 = vadd.s32 %v58_v17, %v57_v9 }
  0xbb   :  { %v606_v25 = vadd.f32 %v605_v42, %v593_v7 }
  0xbc   :  { %v559_v23 = vadd.f32 %v558_v19, %v534_v29  ;;  %vm64_vm5 = vcmp.lt.s32.totalorder %v59_v63, 8 }
  0xbd   :  { %v609_v61 = vadd.f32 %v608_v53, %v606_v25 }
  0xbe   :  { %v694_v1 = vsub.f32 %v559_v23, %v1604_v34  ;;  %v798_v34 = vpop.eup %797 }
  0xbf   :  { %v614_v36 = vadd.f32 %v613_v20, %v609_v61  ;;  %v435_v4 = vmul.f32 %v798_v34, %v1554_v32 }
  0xc1   :  { %v621_v48 = vadd.f32 %v620_v27, %v614_v36  ;;  %v689_v38 = vmul.f32 %v794_v16, %v435_v4 }
  0xc3   :  { %v630_v52 = vadd.f32 %v629_v30, %v621_v48  ;;  %v690_v7 = vmul.f32 %v689_v38, %v689_v38 }
  0xc5   :  { %v641_v14 = vadd.f32 %v640_v6, %v630_v52 }
  0xc7   :  { %v644_v21 = vadd.f32 %v643_v10, %v641_v14 }
  0xc9   :  { %v649_v33 = vadd.f32 %v648_v58, %v644_v21 }
  0xcb   :  { %v656_v15 = vadd.f32 %v655_v0, %v649_v33 }
  0xcd   :  { %v665_v46 = vadd.f32 %v664_v54, %v656_v15 }
  0xcf   :  { %v668_v5 = vadd.f32 %v667_v24, %v665_v46 }
  0xd1   :  { %v673_v39 = vadd.f32 %v672_v12, %v668_v5 }
  0xd3   :  { %v680_v3 = vadd.f32 %v679_v22, %v673_v39 }
  0xd5   :  { %v683_v50 = vadd.f32 %v682_v28, %v680_v3 }
  0xd7   :  { %v688_v59 = vadd.f32 %v687_v44, %v683_v50 }
  0xd9   :  { %v691_v32 = vadd.f32 %v690_v7, %v688_v59 }
  0xdb   :  { %v744_v2 = vadd.f32 -6.0, %v691_v32 }
  0xdd   :  { %v693_v35 = vmul.f32 0.5, %v744_v2 }
  0xdf   :  { %v695_v8 = vadd.f32 %v694_v1, %v693_v35 }
  0xe1   :  { %v696_v31 = vsel %vm64_vm5, %v695_v8, 0.0 }
  0xe2   :  { %701 = vst [vmem:[#allocation7] sm:$0xff] %v696_v31 }
  0xe3   :  { %854 = shalt.err (!%p851_p6)
}
  0xe4   :  { %s855_s10 = scalar_lea.hbm %s1648_s2, 256 }
  0xe5   :  { %p856_p7 = scmp.ne.s32.totalorder %s1648_s2, %s855_s10  ;;  %p859_p8 = scmp.lt.u32.totalorder %s855_s10, %s1648_s2 }
  0xe7   :  { %p861_p9 = pnand %p859_p8, %p856_p7 }
  0xe9   :  { %864 = shalt.err (!%p861_p9)
}
  0xea   :  { %716 = dma.vmem_to_hbm [thread:$0]  %s711_s6, 256, %s1648_s2, [#allocation4], %s872_s19, %s872_s19, %s873_s20  }
  0xeb   :  { %869 = dma.done.wait [#allocation4], 256  }
  0xec   :  { %870 = vsyncadd [#allocation4], 4294967040 }
  0xed   :  { %720 = vsyncpa [#allocation3], 1 }
  0xee   :  { %721 = vsyncpa [#allocation6], 1 }
  0xef   :  { %722 = vsyncpa [#allocation4], 1 }

</bundles_post_ra>
